<compile_context>
chip_gen: v5e
topology: v5e:2x2
jax: 0.10.0
libtpu: 0.0.40
codegen_flags: <defaults>
</compile_context>

<pallas_src>
import math
import jax
import jax.numpy as jnp
from jax import lax
from jax.experimental import pallas as pl
from jax.experimental.pallas import tpu as pltpu

# ---- config (small, consistent with the module) ----
D_MODEL = 32
N_HEADS = 4
D_HEAD = D_MODEL // N_HEADS
D_FF = 64
NUM_LAYERS = 2          # configs.expert_layers default
SEQ = 8
BATCH = 2
EPS = 1e-5              # torch.nn.LayerNorm default
SCALE = 1.0 / math.sqrt(D_HEAD)

# rows of the [VEC_ROWS, D_MODEL] f32 vector slab
VEC_PER_LAYER = 6                       # bo, b2, n1w, n1b, n2w, n2b
R_BO, R_B2, R_N1W, R_N1B, R_N2W, R_N2B = range(VEC_PER_LAYER)
FW_ROW = NUM_LAYERS * VEC_PER_LAYER     # final-norm weight row
FB_ROW = FW_ROW + 1                     # final-norm bias row
PB_ROW = FW_ROW + 2                     # expert-projection bias row
VEC_ROWS = 16                           # padded to a sublane multiple


def _layernorm(x, w, b):
    # x: [L, D], w/b: [1, D]  (biased variance, like torch LayerNorm)
    mu = jnp.mean(x, axis=-1, keepdims=True)
    var = jnp.mean(jnp.square(x - mu), axis=-1, keepdims=True)
    return (x - mu) * lax.rsqrt(var + EPS) * w + b


def expert_kernel(x_ref, wqkv_ref, bqkv_ref, wo_ref, w1_ref, bff_ref, w2_ref,
                  pw_ref, vec_ref, o_ref):
    f32, bf16 = jnp.float32, jnp.bfloat16
    x = x_ref[0].astype(f32)                     # [SEQ, D_MODEL] for this batch element

    for l in range(NUM_LAYERS):                  # statically unrolled
        vb = l * VEC_PER_LAYER

        # ---- fused QKV projection: one [L,D]x[D,3D] matmul + single bias row ----
        qkv = jnp.dot(x.astype(bf16), wqkv_ref[l],
                      preferred_element_type=f32) + bqkv_ref[l]          # [L, 3D] f32
        qkv_b = qkv.astype(bf16)                 # cast once; slice q/k/v heads from bf16

        # ---- DSAttention (mask=False, tau=1, delta=0), per-head [8,8] tiles ----
        heads = []
        for h in range(N_HEADS):
            c0 = h * D_HEAD
            qh = qkv_b[:, c0:c0 + D_HEAD]
            kh = qkv_b[:, D_MODEL + c0:D_MODEL + c0 + D_HEAD]
            vh = qkv_b[:, 2 * D_MODEL + c0:2 * D_MODEL + c0 + D_HEAD]
            s = jnp.einsum("qe,ke->qk", qh, kh,
                           preferred_element_type=f32) * SCALE           # [L, L] f32
            e = jnp.exp(s - jnp.max(s, axis=-1, keepdims=True))
            p = e * pl.reciprocal(jnp.sum(e, axis=-1, keepdims=True), approx=True)
            heads.append(jnp.dot(p.astype(bf16), vh,
                                 preferred_element_type=f32))            # [L, E]
        o_cat = jnp.concatenate(heads, axis=-1)                          # [L, D], head-major

        # ---- attention output projection (single matmul) + residual + LayerNorm ----
        attn = jnp.dot(o_cat.astype(bf16), wo_ref[l],
                       preferred_element_type=f32) + vec_ref[vb + R_BO:vb + R_BO + 1, :]
        x = _layernorm(x + attn,
                       vec_ref[vb + R_N1W:vb + R_N1W + 1, :],
                       vec_ref[vb + R_N1B:vb + R_N1B + 1, :])

        # ---- position-wise FFN (1x1 conv pair), relu ----
        y = jnp.dot(x.astype(bf16), w1_ref[l],
                    preferred_element_type=f32) + bff_ref[l]             # [L, D_FF]
        y = jnp.maximum(y, 0.0)
        y = jnp.dot(y.astype(bf16), w2_ref[l],
                    preferred_element_type=f32) + vec_ref[vb + R_B2:vb + R_B2 + 1, :]
        x = _layernorm(x + y,
                       vec_ref[vb + R_N2W:vb + R_N2W + 1, :],
                       vec_ref[vb + R_N2B:vb + R_N2B + 1, :])

    # ---- Encoder final LayerNorm + expert projection ----
    x = _layernorm(x, vec_ref[FW_ROW:FW_ROW + 1, :], vec_ref[FB_ROW:FB_ROW + 1, :])
    out = jnp.dot(x.astype(bf16), pw_ref[...],
                  preferred_element_type=f32) + vec_ref[PB_ROW:PB_ROW + 1, :]
    o_ref[0] = out.astype(o_ref.dtype)


def make_params(key):
    ks = list(jax.random.split(key, 24))
    nrm = lambda k, shape, s=0.1: (jax.random.normal(k, shape, jnp.float32) * s)
    nl = NUM_LAYERS
    params = [
        nrm(ks[0],  (nl, D_MODEL, D_MODEL)),   # wq  (stored [in, out])
        nrm(ks[1],  (nl, D_MODEL)),            # bq
        nrm(ks[2],  (nl, D_MODEL, D_MODEL)),   # wk
        nrm(ks[3],  (nl, D_MODEL)),            # bk
        nrm(ks[4],  (nl, D_MODEL, D_MODEL)),   # wv
        nrm(ks[5],  (nl, D_MODEL)),            # bv
        nrm(ks[6],  (nl, D_MODEL, D_MODEL)),   # wo  ([H*E, D], head-major rows)
        nrm(ks[7],  (nl, D_MODEL)),            # bo
        nrm(ks[8],  (nl, D_MODEL, D_FF)),      # conv1 weight (1x1) as [in, out]
        nrm(ks[9],  (nl, D_FF)),               # conv1 bias
        nrm(ks[10], (nl, D_FF, D_MODEL)),      # conv2 weight (1x1) as [in, out]
        nrm(ks[11], (nl, D_MODEL)),            # conv2 bias
        jnp.ones((nl, D_MODEL), jnp.float32),  # norm1 weight
        jnp.zeros((nl, D_MODEL), jnp.float32), # norm1 bias
        jnp.ones((nl, D_MODEL), jnp.float32),  # norm2 weight
        jnp.zeros((nl, D_MODEL), jnp.float32), # norm2 bias
        jnp.ones((1, D_MODEL), jnp.float32),   # final norm weight
        jnp.zeros((1, D_MODEL), jnp.float32),  # final norm bias
        nrm(ks[12], (D_MODEL, D_MODEL)),       # expert_projection weight [in, out]
        nrm(ks[13], (1, D_MODEL)),             # expert_projection bias
    ]
    return params


def pack_params(params):
    """Repack module parameters into kernel-friendly arrays (layout plumbing only).
    No batch/head replication: Wqkv is [NL, D, 3D] once, Wo is [NL, D, D] once."""
    (wq, bq, wk, bk, wv, bv, wo, bo, w1, b1, w2, b2,
     n1w, n1b, n2w, n2b, fw, fb, pw, pb) = params
    nl = NUM_LAYERS
    bf16, f32 = jnp.bfloat16, jnp.float32

    wqkv = jnp.concatenate([wq, wk, wv], axis=-1).astype(bf16)            # [NL, D, 3D]
    bqkv = jnp.concatenate([bq, bk, bv], axis=-1).reshape(nl, 1, 3 * D_MODEL).astype(f32)
    wo_p = wo.astype(bf16)                                                # [NL, D, D]
    w1_p = w1.astype(bf16)                                                # [NL, D, F]
    bff = b1.reshape(nl, 1, D_FF).astype(f32)                             # [NL, 1, F]
    w2_p = w2.astype(bf16)                                                # [NL, F, D]
    pw_p = pw.astype(bf16)                                                # [D, D]

    rows = []
    for l in range(nl):
        for v in (bo[l], b2[l], n1w[l], n1b[l], n2w[l], n2b[l]):
            rows.append(v.reshape(1, D_MODEL))
    rows += [fw.reshape(1, D_MODEL), fb.reshape(1, D_MODEL), pb.reshape(1, D_MODEL)]
    rows += [jnp.zeros((1, D_MODEL), f32)] * (VEC_ROWS - len(rows))
    vec = jnp.concatenate(rows, axis=0).astype(f32)                       # [16, 32]

    return wqkv, bqkv, wo_p, w1_p, bff, w2_p, pw_p, vec


def expert_forward(x, packed):
    B, L, D = x.shape
    inputs = (x,) + tuple(packed)

    def full_spec(a):
        return pl.BlockSpec(a.shape, lambda b, _nd=a.ndim: (0,) * _nd)

    in_specs = [pl.BlockSpec((1, L, D), lambda b: (b, 0, 0))]
    in_specs += [full_spec(a) for a in inputs[1:]]

    macs_per_batch = (NUM_LAYERS * (SEQ * D_MODEL * 3 * D_MODEL          # QKV
                                    + 2 * N_HEADS * SEQ * SEQ * D_HEAD   # scores + PV
                                    + SEQ * D_MODEL * D_MODEL            # out proj
                                    + 2 * SEQ * D_MODEL * D_FF)          # FFN
                      + SEQ * D_MODEL * D_MODEL)                         # expert proj
    cost = pl.CostEstimate(
        flops=2 * B * macs_per_batch,
        transcendentals=B * (NUM_LAYERS * (N_HEADS * SEQ * SEQ + N_HEADS * SEQ + 2 * SEQ)
                             + SEQ),
        bytes_accessed=int(sum(a.size * a.dtype.itemsize for a in inputs)
                           + x.size * x.dtype.itemsize))

    return pl.pallas_call(
        expert_kernel,
        out_shape=jax.ShapeDtypeStruct((B, L, D), x.dtype),
        grid=(B,),
        in_specs=in_specs,
        out_specs=pl.BlockSpec((1, L, D), lambda b: (b, 0, 0)),
        compiler_params=pltpu.CompilerParams(dimension_semantics=("parallel",)),
        cost_estimate=cost,
    )(*inputs)


def ref_forward(x, params):
    # pure-JAX reference with the SAME mixed-precision policy as the kernel
    # (bf16 MXU operands, f32 accumulation; LayerNorm/softmax/residuals in f32).
    (wq, bq, wk, bk, wv, bv, wo, bo, w1, b1, w2, b2,
     n1w, n1b, n2w, n2b, fw, fb, pw, pb) = params
    bf16 = jnp.bfloat16

    def ln(z, w, b):
        mu = z.mean(-1, keepdims=True)
        var = ((z - mu) ** 2).mean(-1, keepdims=True)
        return (z - mu) / jnp.sqrt(var + EPS) * w + b

    def mm(a, w):
        return jnp.dot(a.astype(bf16), w.astype(bf16), preferred_element_type=jnp.float32)

    B, L, D = x.shape
    x = x.astype(jnp.float32)
    for l in range(NUM_LAYERS):
        q = (mm(x, wq[l]) + bq[l]).reshape(B, L, N_HEADS, D_HEAD)
        k = (mm(x, wk[l]) + bk[l]).reshape(B, L, N_HEADS, D_HEAD)
        v = (mm(x, wv[l]) + bv[l]).reshape(B, L, N_HEADS, D_HEAD)
        scores = jnp.einsum("blhe,bshe->bhls", q.astype(bf16), k.astype(bf16),
                            preferred_element_type=jnp.float32)
        a = jax.nn.softmax(SCALE * scores, axis=-1)
        o = jnp.einsum("bhls,bshe->blhe", a.astype(bf16), v.astype(bf16),
                       preferred_element_type=jnp.float32).reshape(B, L, D)
        x = x + (mm(o, wo[l]) + bo[l])
        x = ln(x, n1w[l], n1b[l])
        y = jnp.maximum(mm(x, w1[l]) + b1[l], 0.0)
        y = mm(y, w2[l]) + b2[l]
        x = ln(x + y, n2w[l], n2b[l])
    x = ln(x, fw[0], fb[0])
    return mm(x, pw) + pb[0]


if __name__ == "__main__":
    key = jax.random.PRNGKey(0)
    kx, kp = jax.random.split(key)
    x = jax.random.normal(kx, (BATCH, SEQ, D_MODEL), jnp.float32)
    params = make_params(kp)
    packed = pack_params(params)

    out = jax.block_until_ready(expert_forward(x, packed))
    ref = jax.block_until_ready(ref_forward(x, params))

    assert out.shape == (BATCH, SEQ, D_MODEL)
    err = float(jnp.max(jnp.abs(out - ref)))
    assert jnp.allclose(out, ref, rtol=2e-2, atol=5e-3), err

    print("KERNEL_OK")
</pallas_src>

<mosaic_0001>
module attributes {stable_mosaic.version = 11 : i64} {
  func.func @expert_kernel(%arg0: i32, %arg1: memref<1x8x32xf32, #tpu.memory_space<vmem>>, %arg2: memref<2x32x96xbf16, #tpu.memory_space<vmem>>, %arg3: memref<2x1x96xf32, #tpu.memory_space<vmem>>, %arg4: memref<2x32x32xbf16, #tpu.memory_space<vmem>>, %arg5: memref<2x32x64xbf16, #tpu.memory_space<vmem>>, %arg6: memref<2x1x64xf32, #tpu.memory_space<vmem>>, %arg7: memref<2x64x32xbf16, #tpu.memory_space<vmem>>, %arg8: memref<32x32xbf16, #tpu.memory_space<vmem>>, %arg9: memref<16x32xf32, #tpu.memory_space<vmem>>, %arg10: memref<1x8x32xf32, #tpu.memory_space<vmem>>) attributes {dimension_semantics = [#tpu.dimension_semantics<parallel>], iteration_bounds = array<i64: 2>, scalar_prefetch = 0 : i64, scratch_operands = 0 : i64, tpu.core_type = #tpu.core_type<tc>, window_params = [{transform_indices = @transform_0, window_bounds = array<i64: 1, 8, 32>}, {pipeline_mode = #tpu.pipeline_mode<synchronous>, transform_indices = @transform_1, window_bounds = array<i64: 2, 32, 96>}, {pipeline_mode = #tpu.pipeline_mode<synchronous>, transform_indices = @transform_2, window_bounds = array<i64: 2, 1, 96>}, {pipeline_mode = #tpu.pipeline_mode<synchronous>, transform_indices = @transform_3, window_bounds = array<i64: 2, 32, 32>}, {pipeline_mode = #tpu.pipeline_mode<synchronous>, transform_indices = @transform_4, window_bounds = array<i64: 2, 32, 64>}, {pipeline_mode = #tpu.pipeline_mode<synchronous>, transform_indices = @transform_5, window_bounds = array<i64: 2, 1, 64>}, {pipeline_mode = #tpu.pipeline_mode<synchronous>, transform_indices = @transform_6, window_bounds = array<i64: 2, 64, 32>}, {pipeline_mode = #tpu.pipeline_mode<synchronous>, transform_indices = @transform_7, window_bounds = array<i64: 32, 32>}, {pipeline_mode = #tpu.pipeline_mode<synchronous>, transform_indices = @transform_8, window_bounds = array<i64: 16, 32>}, {transform_indices = @transform_9, window_bounds = array<i64: 1, 8, 32>}]} {
    %c0 = arith.constant 0 : index
    %c0_0 = arith.constant 0 : index
    %c0_1 = arith.constant 0 : index
    %0 = vector.load %arg1[%c0, %c0_0, %c0_1] : memref<1x8x32xf32, #tpu.memory_space<vmem>>, vector<1x8x32xf32>
    %1 = vector.shape_cast %0 : vector<1x8x32xf32> to vector<8x32xf32>
    %2 = arith.truncf %1 : vector<8x32xf32> to vector<8x32xbf16>
    %c0_2 = arith.constant 0 : index
    %c0_3 = arith.constant 0 : index
    %c0_4 = arith.constant 0 : index
    %3 = vector.load %arg2[%c0_2, %c0_3, %c0_4] : memref<2x32x96xbf16, #tpu.memory_space<vmem>>, vector<1x32x96xbf16>
    %4 = vector.shape_cast %3 : vector<1x32x96xbf16> to vector<32x96xbf16>
    %cst = arith.constant dense<0.000000e+00> : vector<8x96xf32>
    %5 = tpu.matmul %2, %4, %cst {dimension_numbers = #tpu.dot_dimension_numbers<[1], [0], [0], [1], [0, 0, 1, 1], [], []>} : vector<8x32xbf16>, vector<32x96xbf16>, vector<8x96xf32> -> vector<8x96xf32>
    %c0_5 = arith.constant 0 : index
    %c0_6 = arith.constant 0 : index
    %c0_7 = arith.constant 0 : index
    %6 = vector.load %arg3[%c0_5, %c0_6, %c0_7] : memref<2x1x96xf32, #tpu.memory_space<vmem>>, vector<1x1x96xf32>
    %7 = vector.shape_cast %6 : vector<1x1x96xf32> to vector<1x96xf32>
    %8 = vector.broadcast %7 : vector<1x96xf32> to vector<8x96xf32>
    %9 = arith.addf %5, %8 : vector<8x96xf32>
    %10 = arith.truncf %9 : vector<8x96xf32> to vector<8x96xbf16>
    %11 = vector.extract_strided_slice %10 {offsets = [0, 0], sizes = [8, 8], strides = [1, 1]} : vector<8x96xbf16> to vector<8x8xbf16>
    %12 = vector.extract_strided_slice %10 {offsets = [0, 32], sizes = [8, 8], strides = [1, 1]} : vector<8x96xbf16> to vector<8x8xbf16>
    %13 = vector.extract_strided_slice %10 {offsets = [0, 64], sizes = [8, 8], strides = [1, 1]} : vector<8x96xbf16> to vector<8x8xbf16>
    "tpu.trace_start"() <{level = 10 : i32, message = "qe,ke->qk"}> : () -> ()
    %cst_8 = arith.constant dense<0.000000e+00> : vector<8x8xf32>
    %14 = tpu.matmul %11, %12, %cst_8 {dimension_numbers = #tpu.dot_dimension_numbers<[1], [1], [0], [0], [0, 0, 1, 0], [], []>} : vector<8x8xbf16>, vector<8x8xbf16>, vector<8x8xf32> -> vector<8x8xf32>
    "tpu.trace_stop"() : () -> ()
    %cst_9 = arith.constant 0.353553385 : f32
    %15 = vector.broadcast %cst_9 : f32 to vector<8x8xf32>
    %16 = arith.mulf %14, %15 : vector<8x8xf32>
    %cst_10 = arith.constant dense<0xFF800000> : vector<8xf32>
    %17 = vector.multi_reduction <maximumf>, %16, %cst_10 [1] : vector<8x8xf32> to vector<8xf32>
    %18 = vector.shape_cast %17 : vector<8xf32> to vector<8x1xf32>
    %19 = vector.broadcast %18 : vector<8x1xf32> to vector<8x8xf32>
    %20 = arith.subf %16, %19 : vector<8x8xf32>
    %21 = math.exp %20 : vector<8x8xf32>
    %cst_11 = arith.constant dense<0.000000e+00> : vector<8xf32>
    %22 = vector.multi_reduction <add>, %21, %cst_11 [1] : vector<8x8xf32> to vector<8xf32>
    %23 = vector.shape_cast %22 : vector<8xf32> to vector<8x1xf32>
    %24 = tpu.reciprocal %23 {approx = true} : vector<8x1xf32> -> vector<8x1xf32>
    %25 = vector.broadcast %24 : vector<8x1xf32> to vector<8x8xf32>
    %26 = arith.mulf %21, %25 : vector<8x8xf32>
    %27 = arith.truncf %26 : vector<8x8xf32> to vector<8x8xbf16>
    %cst_12 = arith.constant dense<0.000000e+00> : vector<8x8xf32>
    %28 = tpu.matmul %27, %13, %cst_12 {dimension_numbers = #tpu.dot_dimension_numbers<[1], [0], [0], [1], [0, 0, 1, 1], [], []>} : vector<8x8xbf16>, vector<8x8xbf16>, vector<8x8xf32> -> vector<8x8xf32>
    %29 = vector.extract_strided_slice %10 {offsets = [0, 8], sizes = [8, 8], strides = [1, 1]} : vector<8x96xbf16> to vector<8x8xbf16>
    %30 = vector.extract_strided_slice %10 {offsets = [0, 40], sizes = [8, 8], strides = [1, 1]} : vector<8x96xbf16> to vector<8x8xbf16>
    %31 = vector.extract_strided_slice %10 {offsets = [0, 72], sizes = [8, 8], strides = [1, 1]} : vector<8x96xbf16> to vector<8x8xbf16>
    "tpu.trace_start"() <{level = 10 : i32, message = "qe,ke->qk"}> : () -> ()
    %cst_13 = arith.constant dense<0.000000e+00> : vector<8x8xf32>
    %32 = tpu.matmul %29, %30, %cst_13 {dimension_numbers = #tpu.dot_dimension_numbers<[1], [1], [0], [0], [0, 0, 1, 0], [], []>} : vector<8x8xbf16>, vector<8x8xbf16>, vector<8x8xf32> -> vector<8x8xf32>
    "tpu.trace_stop"() : () -> ()
    %cst_14 = arith.constant 0.353553385 : f32
    %33 = vector.broadcast %cst_14 : f32 to vector<8x8xf32>
    %34 = arith.mulf %32, %33 : vector<8x8xf32>
    %cst_15 = arith.constant dense<0xFF800000> : vector<8xf32>
    %35 = vector.multi_reduction <maximumf>, %34, %cst_15 [1] : vector<8x8xf32> to vector<8xf32>
    %36 = vector.shape_cast %35 : vector<8xf32> to vector<8x1xf32>
    %37 = vector.broadcast %36 : vector<8x1xf32> to vector<8x8xf32>
    %38 = arith.subf %34, %37 : vector<8x8xf32>
    %39 = math.exp %38 : vector<8x8xf32>
    %cst_16 = arith.constant dense<0.000000e+00> : vector<8xf32>
    %40 = vector.multi_reduction <add>, %39, %cst_16 [1] : vector<8x8xf32> to vector<8xf32>
    %41 = vector.shape_cast %40 : vector<8xf32> to vector<8x1xf32>
    %42 = tpu.reciprocal %41 {approx = true} : vector<8x1xf32> -> vector<8x1xf32>
    %43 = vector.broadcast %42 : vector<8x1xf32> to vector<8x8xf32>
    %44 = arith.mulf %39, %43 : vector<8x8xf32>
    %45 = arith.truncf %44 : vector<8x8xf32> to vector<8x8xbf16>
    %cst_17 = arith.constant dense<0.000000e+00> : vector<8x8xf32>
    %46 = tpu.matmul %45, %31, %cst_17 {dimension_numbers = #tpu.dot_dimension_numbers<[1], [0], [0], [1], [0, 0, 1, 1], [], []>} : vector<8x8xbf16>, vector<8x8xbf16>, vector<8x8xf32> -> vector<8x8xf32>
    %47 = vector.extract_strided_slice %10 {offsets = [0, 16], sizes = [8, 8], strides = [1, 1]} : vector<8x96xbf16> to vector<8x8xbf16>
    %48 = vector.extract_strided_slice %10 {offsets = [0, 48], sizes = [8, 8], strides = [1, 1]} : vector<8x96xbf16> to vector<8x8xbf16>
    %49 = vector.extract_strided_slice %10 {offsets = [0, 80], sizes = [8, 8], strides = [1, 1]} : vector<8x96xbf16> to vector<8x8xbf16>
    "tpu.trace_start"() <{level = 10 : i32, message = "qe,ke->qk"}> : () -> ()
    %cst_18 = arith.constant dense<0.000000e+00> : vector<8x8xf32>
    %50 = tpu.matmul %47, %48, %cst_18 {dimension_numbers = #tpu.dot_dimension_numbers<[1], [1], [0], [0], [0, 0, 1, 0], [], []>} : vector<8x8xbf16>, vector<8x8xbf16>, vector<8x8xf32> -> vector<8x8xf32>
    "tpu.trace_stop"() : () -> ()
    %cst_19 = arith.constant 0.353553385 : f32
    %51 = vector.broadcast %cst_19 : f32 to vector<8x8xf32>
    %52 = arith.mulf %50, %51 : vector<8x8xf32>
    %cst_20 = arith.constant dense<0xFF800000> : vector<8xf32>
    %53 = vector.multi_reduction <maximumf>, %52, %cst_20 [1] : vector<8x8xf32> to vector<8xf32>
    %54 = vector.shape_cast %53 : vector<8xf32> to vector<8x1xf32>
    %55 = vector.broadcast %54 : vector<8x1xf32> to vector<8x8xf32>
    %56 = arith.subf %52, %55 : vector<8x8xf32>
    %57 = math.exp %56 : vector<8x8xf32>
    %cst_21 = arith.constant dense<0.000000e+00> : vector<8xf32>
    %58 = vector.multi_reduction <add>, %57, %cst_21 [1] : vector<8x8xf32> to vector<8xf32>
    %59 = vector.shape_cast %58 : vector<8xf32> to vector<8x1xf32>
    %60 = tpu.reciprocal %59 {approx = true} : vector<8x1xf32> -> vector<8x1xf32>
    %61 = vector.broadcast %60 : vector<8x1xf32> to vector<8x8xf32>
    %62 = arith.mulf %57, %61 : vector<8x8xf32>
    %63 = arith.truncf %62 : vector<8x8xf32> to vector<8x8xbf16>
    %cst_22 = arith.constant dense<0.000000e+00> : vector<8x8xf32>
    %64 = tpu.matmul %63, %49, %cst_22 {dimension_numbers = #tpu.dot_dimension_numbers<[1], [0], [0], [1], [0, 0, 1, 1], [], []>} : vector<8x8xbf16>, vector<8x8xbf16>, vector<8x8xf32> -> vector<8x8xf32>
    %65 = vector.extract_strided_slice %10 {offsets = [0, 24], sizes = [8, 8], strides = [1, 1]} : vector<8x96xbf16> to vector<8x8xbf16>
    %66 = vector.extract_strided_slice %10 {offsets = [0, 56], sizes = [8, 8], strides = [1, 1]} : vector<8x96xbf16> to vector<8x8xbf16>
    %67 = vector.extract_strided_slice %10 {offsets = [0, 88], sizes = [8, 8], strides = [1, 1]} : vector<8x96xbf16> to vector<8x8xbf16>
    "tpu.trace_start"() <{level = 10 : i32, message = "qe,ke->qk"}> : () -> ()
    %cst_23 = arith.constant dense<0.000000e+00> : vector<8x8xf32>
    %68 = tpu.matmul %65, %66, %cst_23 {dimension_numbers = #tpu.dot_dimension_numbers<[1], [1], [0], [0], [0, 0, 1, 0], [], []>} : vector<8x8xbf16>, vector<8x8xbf16>, vector<8x8xf32> -> vector<8x8xf32>
    "tpu.trace_stop"() : () -> ()
    %cst_24 = arith.constant 0.353553385 : f32
    %69 = vector.broadcast %cst_24 : f32 to vector<8x8xf32>
    %70 = arith.mulf %68, %69 : vector<8x8xf32>
    %cst_25 = arith.constant dense<0xFF800000> : vector<8xf32>
    %71 = vector.multi_reduction <maximumf>, %70, %cst_25 [1] : vector<8x8xf32> to vector<8xf32>
    %72 = vector.shape_cast %71 : vector<8xf32> to vector<8x1xf32>
    %73 = vector.broadcast %72 : vector<8x1xf32> to vector<8x8xf32>
    %74 = arith.subf %70, %73 : vector<8x8xf32>
    %75 = math.exp %74 : vector<8x8xf32>
    %cst_26 = arith.constant dense<0.000000e+00> : vector<8xf32>
    %76 = vector.multi_reduction <add>, %75, %cst_26 [1] : vector<8x8xf32> to vector<8xf32>
    %77 = vector.shape_cast %76 : vector<8xf32> to vector<8x1xf32>
    %78 = tpu.reciprocal %77 {approx = true} : vector<8x1xf32> -> vector<8x1xf32>
    %79 = vector.broadcast %78 : vector<8x1xf32> to vector<8x8xf32>
    %80 = arith.mulf %75, %79 : vector<8x8xf32>
    %81 = arith.truncf %80 : vector<8x8xf32> to vector<8x8xbf16>
    %cst_27 = arith.constant dense<0.000000e+00> : vector<8x8xf32>
    %82 = tpu.matmul %81, %67, %cst_27 {dimension_numbers = #tpu.dot_dimension_numbers<[1], [0], [0], [1], [0, 0, 1, 1], [], []>} : vector<8x8xbf16>, vector<8x8xbf16>, vector<8x8xf32> -> vector<8x8xf32>
    %83 = tpu.concatenate %28, %46, %64, %82 in 1 : vector<8x8xf32>, vector<8x8xf32>, vector<8x8xf32>, vector<8x8xf32> -> vector<8x32xf32>
    %84 = arith.truncf %83 : vector<8x32xf32> to vector<8x32xbf16>
    %c0_28 = arith.constant 0 : index
    %c0_29 = arith.constant 0 : index
    %c0_30 = arith.constant 0 : index
    %85 = vector.load %arg4[%c0_28, %c0_29, %c0_30] : memref<2x32x32xbf16, #tpu.memory_space<vmem>>, vector<1x32x32xbf16>
    %86 = vector.shape_cast %85 : vector<1x32x32xbf16> to vector<32x32xbf16>
    %cst_31 = arith.constant dense<0.000000e+00> : vector<8x32xf32>
    %87 = tpu.matmul %84, %86, %cst_31 {dimension_numbers = #tpu.dot_dimension_numbers<[1], [0], [0], [1], [0, 0, 1, 1], [], []>} : vector<8x32xbf16>, vector<32x32xbf16>, vector<8x32xf32> -> vector<8x32xf32>
    %c0_32 = arith.constant 0 : index
    %c0_33 = arith.constant 0 : index
    %88 = vector.load %arg9[%c0_32, %c0_33] : memref<16x32xf32, #tpu.memory_space<vmem>>, vector<1x32xf32>
    %89 = vector.broadcast %88 : vector<1x32xf32> to vector<8x32xf32>
    %90 = arith.addf %87, %89 : vector<8x32xf32>
    %91 = arith.addf %1, %90 : vector<8x32xf32>
    %c2 = arith.constant 2 : index
    %c0_34 = arith.constant 0 : index
    %92 = vector.load %arg9[%c2, %c0_34] : memref<16x32xf32, #tpu.memory_space<vmem>>, vector<1x32xf32>
    %c3 = arith.constant 3 : index
    %c0_35 = arith.constant 0 : index
    %93 = vector.load %arg9[%c3, %c0_35] : memref<16x32xf32, #tpu.memory_space<vmem>>, vector<1x32xf32>
    %cst_36 = arith.constant dense<0.000000e+00> : vector<8xf32>
    %94 = vector.multi_reduction <add>, %91, %cst_36 [1] : vector<8x32xf32> to vector<8xf32>
    %95 = vector.shape_cast %94 : vector<8xf32> to vector<8x1xf32>
    %cst_37 = arith.constant 3.200000e+01 : f32
    %96 = vector.broadcast %cst_37 : f32 to vector<8x1xf32>
    %97 = arith.divf %95, %96 : vector<8x1xf32>
    %98 = vector.broadcast %97 : vector<8x1xf32> to vector<8x32xf32>
    %99 = arith.subf %91, %98 : vector<8x32xf32>
    %100 = arith.mulf %99, %99 : vector<8x32xf32>
    %cst_38 = arith.constant dense<0.000000e+00> : vector<8xf32>
    %101 = vector.multi_reduction <add>, %100, %cst_38 [1] : vector<8x32xf32> to vector<8xf32>
    %102 = vector.shape_cast %101 : vector<8xf32> to vector<8x1xf32>
    %cst_39 = arith.constant 3.200000e+01 : f32
    %103 = vector.broadcast %cst_39 : f32 to vector<8x1xf32>
    %104 = arith.divf %102, %103 : vector<8x1xf32>
    %105 = vector.broadcast %97 : vector<8x1xf32> to vector<8x32xf32>
    %106 = arith.subf %91, %105 : vector<8x32xf32>
    %cst_40 = arith.constant 9.99999974E-6 : f32
    %107 = vector.broadcast %cst_40 : f32 to vector<8x1xf32>
    %108 = arith.addf %104, %107 : vector<8x1xf32>
    %109 = math.rsqrt %108 : vector<8x1xf32>
    %110 = vector.broadcast %109 : vector<8x1xf32> to vector<8x32xf32>
    %111 = arith.mulf %106, %110 : vector<8x32xf32>
    %112 = vector.broadcast %92 : vector<1x32xf32> to vector<8x32xf32>
    %113 = arith.mulf %111, %112 : vector<8x32xf32>
    %114 = vector.broadcast %93 : vector<1x32xf32> to vector<8x32xf32>
    %115 = arith.addf %113, %114 : vector<8x32xf32>
    %116 = arith.truncf %115 : vector<8x32xf32> to vector<8x32xbf16>
    %c0_41 = arith.constant 0 : index
    %c0_42 = arith.constant 0 : index
    %c0_43 = arith.constant 0 : index
    %117 = vector.load %arg5[%c0_41, %c0_42, %c0_43] : memref<2x32x64xbf16, #tpu.memory_space<vmem>>, vector<1x32x64xbf16>
    %118 = vector.shape_cast %117 : vector<1x32x64xbf16> to vector<32x64xbf16>
    %cst_44 = arith.constant dense<0.000000e+00> : vector<8x64xf32>
    %119 = tpu.matmul %116, %118, %cst_44 {dimension_numbers = #tpu.dot_dimension_numbers<[1], [0], [0], [1], [0, 0, 1, 1], [], []>} : vector<8x32xbf16>, vector<32x64xbf16>, vector<8x64xf32> -> vector<8x64xf32>
    %c0_45 = arith.constant 0 : index
    %c0_46 = arith.constant 0 : index
    %c0_47 = arith.constant 0 : index
    %120 = vector.load %arg6[%c0_45, %c0_46, %c0_47] : memref<2x1x64xf32, #tpu.memory_space<vmem>>, vector<1x1x64xf32>
    %121 = vector.shape_cast %120 : vector<1x1x64xf32> to vector<1x64xf32>
    %122 = vector.broadcast %121 : vector<1x64xf32> to vector<8x64xf32>
    %123 = arith.addf %119, %122 : vector<8x64xf32>
    %cst_48 = arith.constant 0.000000e+00 : f32
    %124 = vector.broadcast %cst_48 : f32 to vector<8x64xf32>
    %125 = arith.maximumf %123, %124 : vector<8x64xf32>
    %126 = arith.truncf %125 : vector<8x64xf32> to vector<8x64xbf16>
    %c0_49 = arith.constant 0 : index
    %c0_50 = arith.constant 0 : index
    %c0_51 = arith.constant 0 : index
    %127 = vector.load %arg7[%c0_49, %c0_50, %c0_51] : memref<2x64x32xbf16, #tpu.memory_space<vmem>>, vector<1x64x32xbf16>
    %128 = vector.shape_cast %127 : vector<1x64x32xbf16> to vector<64x32xbf16>
    %cst_52 = arith.constant dense<0.000000e+00> : vector<8x32xf32>
    %129 = tpu.matmul %126, %128, %cst_52 {dimension_numbers = #tpu.dot_dimension_numbers<[1], [0], [0], [1], [0, 0, 1, 1], [], []>} : vector<8x64xbf16>, vector<64x32xbf16>, vector<8x32xf32> -> vector<8x32xf32>
    %c1 = arith.constant 1 : index
    %c0_53 = arith.constant 0 : index
    %130 = vector.load %arg9[%c1, %c0_53] : memref<16x32xf32, #tpu.memory_space<vmem>>, vector<1x32xf32>
    %131 = vector.broadcast %130 : vector<1x32xf32> to vector<8x32xf32>
    %132 = arith.addf %129, %131 : vector<8x32xf32>
    %133 = arith.addf %115, %132 : vector<8x32xf32>
    %c4 = arith.constant 4 : index
    %c0_54 = arith.constant 0 : index
    %134 = vector.load %arg9[%c4, %c0_54] : memref<16x32xf32, #tpu.memory_space<vmem>>, vector<1x32xf32>
    %c5 = arith.constant 5 : index
    %c0_55 = arith.constant 0 : index
    %135 = vector.load %arg9[%c5, %c0_55] : memref<16x32xf32, #tpu.memory_space<vmem>>, vector<1x32xf32>
    %cst_56 = arith.constant dense<0.000000e+00> : vector<8xf32>
    %136 = vector.multi_reduction <add>, %133, %cst_56 [1] : vector<8x32xf32> to vector<8xf32>
    %137 = vector.shape_cast %136 : vector<8xf32> to vector<8x1xf32>
    %cst_57 = arith.constant 3.200000e+01 : f32
    %138 = vector.broadcast %cst_57 : f32 to vector<8x1xf32>
    %139 = arith.divf %137, %138 : vector<8x1xf32>
    %140 = vector.broadcast %139 : vector<8x1xf32> to vector<8x32xf32>
    %141 = arith.subf %133, %140 : vector<8x32xf32>
    %142 = arith.mulf %141, %141 : vector<8x32xf32>
    %cst_58 = arith.constant dense<0.000000e+00> : vector<8xf32>
    %143 = vector.multi_reduction <add>, %142, %cst_58 [1] : vector<8x32xf32> to vector<8xf32>
    %144 = vector.shape_cast %143 : vector<8xf32> to vector<8x1xf32>
    %cst_59 = arith.constant 3.200000e+01 : f32
    %145 = vector.broadcast %cst_59 : f32 to vector<8x1xf32>
    %146 = arith.divf %144, %145 : vector<8x1xf32>
    %147 = vector.broadcast %139 : vector<8x1xf32> to vector<8x32xf32>
    %148 = arith.subf %133, %147 : vector<8x32xf32>
    %cst_60 = arith.constant 9.99999974E-6 : f32
    %149 = vector.broadcast %cst_60 : f32 to vector<8x1xf32>
    %150 = arith.addf %146, %149 : vector<8x1xf32>
    %151 = math.rsqrt %150 : vector<8x1xf32>
    %152 = vector.broadcast %151 : vector<8x1xf32> to vector<8x32xf32>
    %153 = arith.mulf %148, %152 : vector<8x32xf32>
    %154 = vector.broadcast %134 : vector<1x32xf32> to vector<8x32xf32>
    %155 = arith.mulf %153, %154 : vector<8x32xf32>
    %156 = vector.broadcast %135 : vector<1x32xf32> to vector<8x32xf32>
    %157 = arith.addf %155, %156 : vector<8x32xf32>
    %158 = arith.truncf %157 : vector<8x32xf32> to vector<8x32xbf16>
    %c1_61 = arith.constant 1 : index
    %c0_62 = arith.constant 0 : index
    %c0_63 = arith.constant 0 : index
    %159 = vector.load %arg2[%c1_61, %c0_62, %c0_63] : memref<2x32x96xbf16, #tpu.memory_space<vmem>>, vector<1x32x96xbf16>
    %160 = vector.shape_cast %159 : vector<1x32x96xbf16> to vector<32x96xbf16>
    %cst_64 = arith.constant dense<0.000000e+00> : vector<8x96xf32>
    %161 = tpu.matmul %158, %160, %cst_64 {dimension_numbers = #tpu.dot_dimension_numbers<[1], [0], [0], [1], [0, 0, 1, 1], [], []>} : vector<8x32xbf16>, vector<32x96xbf16>, vector<8x96xf32> -> vector<8x96xf32>
    %c1_65 = arith.constant 1 : index
    %c0_66 = arith.constant 0 : index
    %c0_67 = arith.constant 0 : index
    %162 = vector.load %arg3[%c1_65, %c0_66, %c0_67] : memref<2x1x96xf32, #tpu.memory_space<vmem>>, vector<1x1x96xf32>
    %163 = vector.shape_cast %162 : vector<1x1x96xf32> to vector<1x96xf32>
    %164 = vector.broadcast %163 : vector<1x96xf32> to vector<8x96xf32>
    %165 = arith.addf %161, %164 : vector<8x96xf32>
    %166 = arith.truncf %165 : vector<8x96xf32> to vector<8x96xbf16>
    %167 = vector.extract_strided_slice %166 {offsets = [0, 0], sizes = [8, 8], strides = [1, 1]} : vector<8x96xbf16> to vector<8x8xbf16>
    %168 = vector.extract_strided_slice %166 {offsets = [0, 32], sizes = [8, 8], strides = [1, 1]} : vector<8x96xbf16> to vector<8x8xbf16>
    %169 = vector.extract_strided_slice %166 {offsets = [0, 64], sizes = [8, 8], strides = [1, 1]} : vector<8x96xbf16> to vector<8x8xbf16>
    "tpu.trace_start"() <{level = 10 : i32, message = "qe,ke->qk"}> : () -> ()
    %cst_68 = arith.constant dense<0.000000e+00> : vector<8x8xf32>
    %170 = tpu.matmul %167, %168, %cst_68 {dimension_numbers = #tpu.dot_dimension_numbers<[1], [1], [0], [0], [0, 0, 1, 0], [], []>} : vector<8x8xbf16>, vector<8x8xbf16>, vector<8x8xf32> -> vector<8x8xf32>
    "tpu.trace_stop"() : () -> ()
    %cst_69 = arith.constant 0.353553385 : f32
    %171 = vector.broadcast %cst_69 : f32 to vector<8x8xf32>
    %172 = arith.mulf %170, %171 : vector<8x8xf32>
    %cst_70 = arith.constant dense<0xFF800000> : vector<8xf32>
    %173 = vector.multi_reduction <maximumf>, %172, %cst_70 [1] : vector<8x8xf32> to vector<8xf32>
    %174 = vector.shape_cast %173 : vector<8xf32> to vector<8x1xf32>
    %175 = vector.broadcast %174 : vector<8x1xf32> to vector<8x8xf32>
    %176 = arith.subf %172, %175 : vector<8x8xf32>
    %177 = math.exp %176 : vector<8x8xf32>
    %cst_71 = arith.constant dense<0.000000e+00> : vector<8xf32>
    %178 = vector.multi_reduction <add>, %177, %cst_71 [1] : vector<8x8xf32> to vector<8xf32>
    %179 = vector.shape_cast %178 : vector<8xf32> to vector<8x1xf32>
    %180 = tpu.reciprocal %179 {approx = true} : vector<8x1xf32> -> vector<8x1xf32>
    %181 = vector.broadcast %180 : vector<8x1xf32> to vector<8x8xf32>
    %182 = arith.mulf %177, %181 : vector<8x8xf32>
    %183 = arith.truncf %182 : vector<8x8xf32> to vector<8x8xbf16>
    %cst_72 = arith.constant dense<0.000000e+00> : vector<8x8xf32>
    %184 = tpu.matmul %183, %169, %cst_72 {dimension_numbers = #tpu.dot_dimension_numbers<[1], [0], [0], [1], [0, 0, 1, 1], [], []>} : vector<8x8xbf16>, vector<8x8xbf16>, vector<8x8xf32> -> vector<8x8xf32>
    %185 = vector.extract_strided_slice %166 {offsets = [0, 8], sizes = [8, 8], strides = [1, 1]} : vector<8x96xbf16> to vector<8x8xbf16>
    %186 = vector.extract_strided_slice %166 {offsets = [0, 40], sizes = [8, 8], strides = [1, 1]} : vector<8x96xbf16> to vector<8x8xbf16>
    %187 = vector.extract_strided_slice %166 {offsets = [0, 72], sizes = [8, 8], strides = [1, 1]} : vector<8x96xbf16> to vector<8x8xbf16>
    "tpu.trace_start"() <{level = 10 : i32, message = "qe,ke->qk"}> : () -> ()
    %cst_73 = arith.constant dense<0.000000e+00> : vector<8x8xf32>
    %188 = tpu.matmul %185, %186, %cst_73 {dimension_numbers = #tpu.dot_dimension_numbers<[1], [1], [0], [0], [0, 0, 1, 0], [], []>} : vector<8x8xbf16>, vector<8x8xbf16>, vector<8x8xf32> -> vector<8x8xf32>
    "tpu.trace_stop"() : () -> ()
    %cst_74 = arith.constant 0.353553385 : f32
    %189 = vector.broadcast %cst_74 : f32 to vector<8x8xf32>
    %190 = arith.mulf %188, %189 : vector<8x8xf32>
    %cst_75 = arith.constant dense<0xFF800000> : vector<8xf32>
    %191 = vector.multi_reduction <maximumf>, %190, %cst_75 [1] : vector<8x8xf32> to vector<8xf32>
    %192 = vector.shape_cast %191 : vector<8xf32> to vector<8x1xf32>
    %193 = vector.broadcast %192 : vector<8x1xf32> to vector<8x8xf32>
    %194 = arith.subf %190, %193 : vector<8x8xf32>
    %195 = math.exp %194 : vector<8x8xf32>
    %cst_76 = arith.constant dense<0.000000e+00> : vector<8xf32>
    %196 = vector.multi_reduction <add>, %195, %cst_76 [1] : vector<8x8xf32> to vector<8xf32>
    %197 = vector.shape_cast %196 : vector<8xf32> to vector<8x1xf32>
    %198 = tpu.reciprocal %197 {approx = true} : vector<8x1xf32> -> vector<8x1xf32>
    %199 = vector.broadcast %198 : vector<8x1xf32> to vector<8x8xf32>
    %200 = arith.mulf %195, %199 : vector<8x8xf32>
    %201 = arith.truncf %200 : vector<8x8xf32> to vector<8x8xbf16>
    %cst_77 = arith.constant dense<0.000000e+00> : vector<8x8xf32>
    %202 = tpu.matmul %201, %187, %cst_77 {dimension_numbers = #tpu.dot_dimension_numbers<[1], [0], [0], [1], [0, 0, 1, 1], [], []>} : vector<8x8xbf16>, vector<8x8xbf16>, vector<8x8xf32> -> vector<8x8xf32>
    %203 = vector.extract_strided_slice %166 {offsets = [0, 16], sizes = [8, 8], strides = [1, 1]} : vector<8x96xbf16> to vector<8x8xbf16>
    %204 = vector.extract_strided_slice %166 {offsets = [0, 48], sizes = [8, 8], strides = [1, 1]} : vector<8x96xbf16> to vector<8x8xbf16>
    %205 = vector.extract_strided_slice %166 {offsets = [0, 80], sizes = [8, 8], strides = [1, 1]} : vector<8x96xbf16> to vector<8x8xbf16>
    "tpu.trace_start"() <{level = 10 : i32, message = "qe,ke->qk"}> : () -> ()
    %cst_78 = arith.constant dense<0.000000e+00> : vector<8x8xf32>
    %206 = tpu.matmul %203, %204, %cst_78 {dimension_numbers = #tpu.dot_dimension_numbers<[1], [1], [0], [0], [0, 0, 1, 0], [], []>} : vector<8x8xbf16>, vector<8x8xbf16>, vector<8x8xf32> -> vector<8x8xf32>
    "tpu.trace_stop"() : () -> ()
    %cst_79 = arith.constant 0.353553385 : f32
    %207 = vector.broadcast %cst_79 : f32 to vector<8x8xf32>
    %208 = arith.mulf %206, %207 : vector<8x8xf32>
    %cst_80 = arith.constant dense<0xFF800000> : vector<8xf32>
    %209 = vector.multi_reduction <maximumf>, %208, %cst_80 [1] : vector<8x8xf32> to vector<8xf32>
    %210 = vector.shape_cast %209 : vector<8xf32> to vector<8x1xf32>
    %211 = vector.broadcast %210 : vector<8x1xf32> to vector<8x8xf32>
    %212 = arith.subf %208, %211 : vector<8x8xf32>
    %213 = math.exp %212 : vector<8x8xf32>
    %cst_81 = arith.constant dense<0.000000e+00> : vector<8xf32>
    %214 = vector.multi_reduction <add>, %213, %cst_81 [1] : vector<8x8xf32> to vector<8xf32>
    %215 = vector.shape_cast %214 : vector<8xf32> to vector<8x1xf32>
    %216 = tpu.reciprocal %215 {approx = true} : vector<8x1xf32> -> vector<8x1xf32>
    %217 = vector.broadcast %216 : vector<8x1xf32> to vector<8x8xf32>
    %218 = arith.mulf %213, %217 : vector<8x8xf32>
    %219 = arith.truncf %218 : vector<8x8xf32> to vector<8x8xbf16>
    %cst_82 = arith.constant dense<0.000000e+00> : vector<8x8xf32>
    %220 = tpu.matmul %219, %205, %cst_82 {dimension_numbers = #tpu.dot_dimension_numbers<[1], [0], [0], [1], [0, 0, 1, 1], [], []>} : vector<8x8xbf16>, vector<8x8xbf16>, vector<8x8xf32> -> vector<8x8xf32>
    %221 = vector.extract_strided_slice %166 {offsets = [0, 24], sizes = [8, 8], strides = [1, 1]} : vector<8x96xbf16> to vector<8x8xbf16>
    %222 = vector.extract_strided_slice %166 {offsets = [0, 56], sizes = [8, 8], strides = [1, 1]} : vector<8x96xbf16> to vector<8x8xbf16>
    %223 = vector.extract_strided_slice %166 {offsets = [0, 88], sizes = [8, 8], strides = [1, 1]} : vector<8x96xbf16> to vector<8x8xbf16>
    "tpu.trace_start"() <{level = 10 : i32, message = "qe,ke->qk"}> : () -> ()
    %cst_83 = arith.constant dense<0.000000e+00> : vector<8x8xf32>
    %224 = tpu.matmul %221, %222, %cst_83 {dimension_numbers = #tpu.dot_dimension_numbers<[1], [1], [0], [0], [0, 0, 1, 0], [], []>} : vector<8x8xbf16>, vector<8x8xbf16>, vector<8x8xf32> -> vector<8x8xf32>
    "tpu.trace_stop"() : () -> ()
    %cst_84 = arith.constant 0.353553385 : f32
    %225 = vector.broadcast %cst_84 : f32 to vector<8x8xf32>
    %226 = arith.mulf %224, %225 : vector<8x8xf32>
    %cst_85 = arith.constant dense<0xFF800000> : vector<8xf32>
    %227 = vector.multi_reduction <maximumf>, %226, %cst_85 [1] : vector<8x8xf32> to vector<8xf32>
    %228 = vector.shape_cast %227 : vector<8xf32> to vector<8x1xf32>
    %229 = vector.broadcast %228 : vector<8x1xf32> to vector<8x8xf32>
    %230 = arith.subf %226, %229 : vector<8x8xf32>
    %231 = math.exp %230 : vector<8x8xf32>
    %cst_86 = arith.constant dense<0.000000e+00> : vector<8xf32>
    %232 = vector.multi_reduction <add>, %231, %cst_86 [1] : vector<8x8xf32> to vector<8xf32>
    %233 = vector.shape_cast %232 : vector<8xf32> to vector<8x1xf32>
    %234 = tpu.reciprocal %233 {approx = true} : vector<8x1xf32> -> vector<8x1xf32>
    %235 = vector.broadcast %234 : vector<8x1xf32> to vector<8x8xf32>
    %236 = arith.mulf %231, %235 : vector<8x8xf32>
    %237 = arith.truncf %236 : vector<8x8xf32> to vector<8x8xbf16>
    %cst_87 = arith.constant dense<0.000000e+00> : vector<8x8xf32>
    %238 = tpu.matmul %237, %223, %cst_87 {dimension_numbers = #tpu.dot_dimension_numbers<[1], [0], [0], [1], [0, 0, 1, 1], [], []>} : vector<8x8xbf16>, vector<8x8xbf16>, vector<8x8xf32> -> vector<8x8xf32>
    %239 = tpu.concatenate %184, %202, %220, %238 in 1 : vector<8x8xf32>, vector<8x8xf32>, vector<8x8xf32>, vector<8x8xf32> -> vector<8x32xf32>
    %240 = arith.truncf %239 : vector<8x32xf32> to vector<8x32xbf16>
    %c1_88 = arith.constant 1 : index
    %c0_89 = arith.constant 0 : index
    %c0_90 = arith.constant 0 : index
    %241 = vector.load %arg4[%c1_88, %c0_89, %c0_90] : memref<2x32x32xbf16, #tpu.memory_space<vmem>>, vector<1x32x32xbf16>
    %242 = vector.shape_cast %241 : vector<1x32x32xbf16> to vector<32x32xbf16>
    %cst_91 = arith.constant dense<0.000000e+00> : vector<8x32xf32>
    %243 = tpu.matmul %240, %242, %cst_91 {dimension_numbers = #tpu.dot_dimension_numbers<[1], [0], [0], [1], [0, 0, 1, 1], [], []>} : vector<8x32xbf16>, vector<32x32xbf16>, vector<8x32xf32> -> vector<8x32xf32>
    %c6 = arith.constant 6 : index
    %c0_92 = arith.constant 0 : index
    %244 = vector.load %arg9[%c6, %c0_92] : memref<16x32xf32, #tpu.memory_space<vmem>>, vector<1x32xf32>
    %245 = vector.broadcast %244 : vector<1x32xf32> to vector<8x32xf32>
    %246 = arith.addf %243, %245 : vector<8x32xf32>
    %247 = arith.addf %157, %246 : vector<8x32xf32>
    %c8 = arith.constant 8 : index
    %c0_93 = arith.constant 0 : index
    %248 = vector.load %arg9[%c8, %c0_93] : memref<16x32xf32, #tpu.memory_space<vmem>>, vector<1x32xf32>
    %c9 = arith.constant 9 : index
    %c0_94 = arith.constant 0 : index
    %249 = vector.load %arg9[%c9, %c0_94] : memref<16x32xf32, #tpu.memory_space<vmem>>, vector<1x32xf32>
    %cst_95 = arith.constant dense<0.000000e+00> : vector<8xf32>
    %250 = vector.multi_reduction <add>, %247, %cst_95 [1] : vector<8x32xf32> to vector<8xf32>
    %251 = vector.shape_cast %250 : vector<8xf32> to vector<8x1xf32>
    %cst_96 = arith.constant 3.200000e+01 : f32
    %252 = vector.broadcast %cst_96 : f32 to vector<8x1xf32>
    %253 = arith.divf %251, %252 : vector<8x1xf32>
    %254 = vector.broadcast %253 : vector<8x1xf32> to vector<8x32xf32>
    %255 = arith.subf %247, %254 : vector<8x32xf32>
    %256 = arith.mulf %255, %255 : vector<8x32xf32>
    %cst_97 = arith.constant dense<0.000000e+00> : vector<8xf32>
    %257 = vector.multi_reduction <add>, %256, %cst_97 [1] : vector<8x32xf32> to vector<8xf32>
    %258 = vector.shape_cast %257 : vector<8xf32> to vector<8x1xf32>
    %cst_98 = arith.constant 3.200000e+01 : f32
    %259 = vector.broadcast %cst_98 : f32 to vector<8x1xf32>
    %260 = arith.divf %258, %259 : vector<8x1xf32>
    %261 = vector.broadcast %253 : vector<8x1xf32> to vector<8x32xf32>
    %262 = arith.subf %247, %261 : vector<8x32xf32>
    %cst_99 = arith.constant 9.99999974E-6 : f32
    %263 = vector.broadcast %cst_99 : f32 to vector<8x1xf32>
    %264 = arith.addf %260, %263 : vector<8x1xf32>
    %265 = math.rsqrt %264 : vector<8x1xf32>
    %266 = vector.broadcast %265 : vector<8x1xf32> to vector<8x32xf32>
    %267 = arith.mulf %262, %266 : vector<8x32xf32>
    %268 = vector.broadcast %248 : vector<1x32xf32> to vector<8x32xf32>
    %269 = arith.mulf %267, %268 : vector<8x32xf32>
    %270 = vector.broadcast %249 : vector<1x32xf32> to vector<8x32xf32>
    %271 = arith.addf %269, %270 : vector<8x32xf32>
    %272 = arith.truncf %271 : vector<8x32xf32> to vector<8x32xbf16>
    %c1_100 = arith.constant 1 : index
    %c0_101 = arith.constant 0 : index
    %c0_102 = arith.constant 0 : index
    %273 = vector.load %arg5[%c1_100, %c0_101, %c0_102] : memref<2x32x64xbf16, #tpu.memory_space<vmem>>, vector<1x32x64xbf16>
    %274 = vector.shape_cast %273 : vector<1x32x64xbf16> to vector<32x64xbf16>
    %cst_103 = arith.constant dense<0.000000e+00> : vector<8x64xf32>
    %275 = tpu.matmul %272, %274, %cst_103 {dimension_numbers = #tpu.dot_dimension_numbers<[1], [0], [0], [1], [0, 0, 1, 1], [], []>} : vector<8x32xbf16>, vector<32x64xbf16>, vector<8x64xf32> -> vector<8x64xf32>
    %c1_104 = arith.constant 1 : index
    %c0_105 = arith.constant 0 : index
    %c0_106 = arith.constant 0 : index
    %276 = vector.load %arg6[%c1_104, %c0_105, %c0_106] : memref<2x1x64xf32, #tpu.memory_space<vmem>>, vector<1x1x64xf32>
    %277 = vector.shape_cast %276 : vector<1x1x64xf32> to vector<1x64xf32>
    %278 = vector.broadcast %277 : vector<1x64xf32> to vector<8x64xf32>
    %279 = arith.addf %275, %278 : vector<8x64xf32>
    %cst_107 = arith.constant 0.000000e+00 : f32
    %280 = vector.broadcast %cst_107 : f32 to vector<8x64xf32>
    %281 = arith.maximumf %279, %280 : vector<8x64xf32>
    %282 = arith.truncf %281 : vector<8x64xf32> to vector<8x64xbf16>
    %c1_108 = arith.constant 1 : index
    %c0_109 = arith.constant 0 : index
    %c0_110 = arith.constant 0 : index
    %283 = vector.load %arg7[%c1_108, %c0_109, %c0_110] : memref<2x64x32xbf16, #tpu.memory_space<vmem>>, vector<1x64x32xbf16>
    %284 = vector.shape_cast %283 : vector<1x64x32xbf16> to vector<64x32xbf16>
    %cst_111 = arith.constant dense<0.000000e+00> : vector<8x32xf32>
    %285 = tpu.matmul %282, %284, %cst_111 {dimension_numbers = #tpu.dot_dimension_numbers<[1], [0], [0], [1], [0, 0, 1, 1], [], []>} : vector<8x64xbf16>, vector<64x32xbf16>, vector<8x32xf32> -> vector<8x32xf32>
    %c7 = arith.constant 7 : index
    %c0_112 = arith.constant 0 : index
    %286 = vector.load %arg9[%c7, %c0_112] : memref<16x32xf32, #tpu.memory_space<vmem>>, vector<1x32xf32>
    %287 = vector.broadcast %286 : vector<1x32xf32> to vector<8x32xf32>
    %288 = arith.addf %285, %287 : vector<8x32xf32>
    %289 = arith.addf %271, %288 : vector<8x32xf32>
    %c10 = arith.constant 10 : index
    %c0_113 = arith.constant 0 : index
    %290 = vector.load %arg9[%c10, %c0_113] : memref<16x32xf32, #tpu.memory_space<vmem>>, vector<1x32xf32>
    %c11 = arith.constant 11 : index
    %c0_114 = arith.constant 0 : index
    %291 = vector.load %arg9[%c11, %c0_114] : memref<16x32xf32, #tpu.memory_space<vmem>>, vector<1x32xf32>
    %cst_115 = arith.constant dense<0.000000e+00> : vector<8xf32>
    %292 = vector.multi_reduction <add>, %289, %cst_115 [1] : vector<8x32xf32> to vector<8xf32>
    %293 = vector.shape_cast %292 : vector<8xf32> to vector<8x1xf32>
    %cst_116 = arith.constant 3.200000e+01 : f32
    %294 = vector.broadcast %cst_116 : f32 to vector<8x1xf32>
    %295 = arith.divf %293, %294 : vector<8x1xf32>
    %296 = vector.broadcast %295 : vector<8x1xf32> to vector<8x32xf32>
    %297 = arith.subf %289, %296 : vector<8x32xf32>
    %298 = arith.mulf %297, %297 : vector<8x32xf32>
    %cst_117 = arith.constant dense<0.000000e+00> : vector<8xf32>
    %299 = vector.multi_reduction <add>, %298, %cst_117 [1] : vector<8x32xf32> to vector<8xf32>
    %300 = vector.shape_cast %299 : vector<8xf32> to vector<8x1xf32>
    %cst_118 = arith.constant 3.200000e+01 : f32
    %301 = vector.broadcast %cst_118 : f32 to vector<8x1xf32>
    %302 = arith.divf %300, %301 : vector<8x1xf32>
    %303 = vector.broadcast %295 : vector<8x1xf32> to vector<8x32xf32>
    %304 = arith.subf %289, %303 : vector<8x32xf32>
    %cst_119 = arith.constant 9.99999974E-6 : f32
    %305 = vector.broadcast %cst_119 : f32 to vector<8x1xf32>
    %306 = arith.addf %302, %305 : vector<8x1xf32>
    %307 = math.rsqrt %306 : vector<8x1xf32>
    %308 = vector.broadcast %307 : vector<8x1xf32> to vector<8x32xf32>
    %309 = arith.mulf %304, %308 : vector<8x32xf32>
    %310 = vector.broadcast %290 : vector<1x32xf32> to vector<8x32xf32>
    %311 = arith.mulf %309, %310 : vector<8x32xf32>
    %312 = vector.broadcast %291 : vector<1x32xf32> to vector<8x32xf32>
    %313 = arith.addf %311, %312 : vector<8x32xf32>
    %c12 = arith.constant 12 : index
    %c0_120 = arith.constant 0 : index
    %314 = vector.load %arg9[%c12, %c0_120] : memref<16x32xf32, #tpu.memory_space<vmem>>, vector<1x32xf32>
    %c13 = arith.constant 13 : index
    %c0_121 = arith.constant 0 : index
    %315 = vector.load %arg9[%c13, %c0_121] : memref<16x32xf32, #tpu.memory_space<vmem>>, vector<1x32xf32>
    %cst_122 = arith.constant dense<0.000000e+00> : vector<8xf32>
    %316 = vector.multi_reduction <add>, %313, %cst_122 [1] : vector<8x32xf32> to vector<8xf32>
    %317 = vector.shape_cast %316 : vector<8xf32> to vector<8x1xf32>
    %cst_123 = arith.constant 3.200000e+01 : f32
    %318 = vector.broadcast %cst_123 : f32 to vector<8x1xf32>
    %319 = arith.divf %317, %318 : vector<8x1xf32>
    %320 = vector.broadcast %319 : vector<8x1xf32> to vector<8x32xf32>
    %321 = arith.subf %313, %320 : vector<8x32xf32>
    %322 = arith.mulf %321, %321 : vector<8x32xf32>
    %cst_124 = arith.constant dense<0.000000e+00> : vector<8xf32>
    %323 = vector.multi_reduction <add>, %322, %cst_124 [1] : vector<8x32xf32> to vector<8xf32>
    %324 = vector.shape_cast %323 : vector<8xf32> to vector<8x1xf32>
    %cst_125 = arith.constant 3.200000e+01 : f32
    %325 = vector.broadcast %cst_125 : f32 to vector<8x1xf32>
    %326 = arith.divf %324, %325 : vector<8x1xf32>
    %327 = vector.broadcast %319 : vector<8x1xf32> to vector<8x32xf32>
    %328 = arith.subf %313, %327 : vector<8x32xf32>
    %cst_126 = arith.constant 9.99999974E-6 : f32
    %329 = vector.broadcast %cst_126 : f32 to vector<8x1xf32>
    %330 = arith.addf %326, %329 : vector<8x1xf32>
    %331 = math.rsqrt %330 : vector<8x1xf32>
    %332 = vector.broadcast %331 : vector<8x1xf32> to vector<8x32xf32>
    %333 = arith.mulf %328, %332 : vector<8x32xf32>
    %334 = vector.broadcast %314 : vector<1x32xf32> to vector<8x32xf32>
    %335 = arith.mulf %333, %334 : vector<8x32xf32>
    %336 = vector.broadcast %315 : vector<1x32xf32> to vector<8x32xf32>
    %337 = arith.addf %335, %336 : vector<8x32xf32>
    %338 = arith.truncf %337 : vector<8x32xf32> to vector<8x32xbf16>
    %c0_127 = arith.constant 0 : index
    %c0_128 = arith.constant 0 : index
    %339 = vector.load %arg8[%c0_127, %c0_128] : memref<32x32xbf16, #tpu.memory_space<vmem>>, vector<32x32xbf16>
    %cst_129 = arith.constant dense<0.000000e+00> : vector<8x32xf32>
    %340 = tpu.matmul %338, %339, %cst_129 {dimension_numbers = #tpu.dot_dimension_numbers<[1], [0], [0], [1], [0, 0, 1, 1], [], []>} : vector<8x32xbf16>, vector<32x32xbf16>, vector<8x32xf32> -> vector<8x32xf32>
    %c14 = arith.constant 14 : index
    %c0_130 = arith.constant 0 : index
    %341 = vector.load %arg9[%c14, %c0_130] : memref<16x32xf32, #tpu.memory_space<vmem>>, vector<1x32xf32>
    %342 = vector.broadcast %341 : vector<1x32xf32> to vector<8x32xf32>
    %343 = arith.addf %340, %342 : vector<8x32xf32>
    %c0_131 = arith.constant 0 : index
    %c0_132 = arith.constant 0 : index
    %c0_133 = arith.constant 0 : index
    %344 = vector.load %arg10[%c0_131, %c0_132, %c0_133] : memref<1x8x32xf32, #tpu.memory_space<vmem>>, vector<1x8x32xf32>
    %345 = vector.shape_cast %344 : vector<1x8x32xf32> to vector<8x32xf32>
    %346 = vector.shape_cast %343 : vector<8x32xf32> to vector<1x8x32xf32>
    tpu.vector_store %arg10[%c0_131, %c0_132, %c0_133], %346 {strides = array<i32>} : memref<1x8x32xf32, #tpu.memory_space<vmem>>, vector<1x8x32xf32>,
    return
  }
  func.func @transform_0(%arg0: i32) -> (i32, i32, i32) {
    %c0_i32 = arith.constant 0 : i32
    %c0_i32_0 = arith.constant 0 : i32
    %c0_i32_1 = arith.constant 0 : i32
    return %arg0, %c0_i32, %c0_i32_0 : i32, i32, i32
  }
  func.func @transform_1(%arg0: i32) -> (i32, i32, i32) {
    %c0_i32 = arith.constant 0 : i32
    %c0_i32_0 = arith.constant 0 : i32
    %c0_i32_1 = arith.constant 0 : i32
    %c0_i32_2 = arith.constant 0 : i32
    return %c0_i32, %c0_i32_0, %c0_i32_1 : i32, i32, i32
  }
  func.func @transform_2(%arg0: i32) -> (i32, i32, i32) {
    %c0_i32 = arith.constant 0 : i32
    %c0_i32_0 = arith.constant 0 : i32
    %c0_i32_1 = arith.constant 0 : i32
    %c0_i32_2 = arith.constant 0 : i32
    return %c0_i32, %c0_i32_0, %c0_i32_1 : i32, i32, i32
  }
  func.func @transform_3(%arg0: i32) -> (i32, i32, i32) {
    %c0_i32 = arith.constant 0 : i32
    %c0_i32_0 = arith.constant 0 : i32
    %c0_i32_1 = arith.constant 0 : i32
    %c0_i32_2 = arith.constant 0 : i32
    return %c0_i32, %c0_i32_0, %c0_i32_1 : i32, i32, i32
  }
  func.func @transform_4(%arg0: i32) -> (i32, i32, i32) {
    %c0_i32 = arith.constant 0 : i32
    %c0_i32_0 = arith.constant 0 : i32
    %c0_i32_1 = arith.constant 0 : i32
    %c0_i32_2 = arith.constant 0 : i32
    return %c0_i32, %c0_i32_0, %c0_i32_1 : i32, i32, i32
  }
  func.func @transform_5(%arg0: i32) -> (i32, i32, i32) {
    %c0_i32 = arith.constant 0 : i32
    %c0_i32_0 = arith.constant 0 : i32
    %c0_i32_1 = arith.constant 0 : i32
    %c0_i32_2 = arith.constant 0 : i32
    return %c0_i32, %c0_i32_0, %c0_i32_1 : i32, i32, i32
  }
  func.func @transform_6(%arg0: i32) -> (i32, i32, i32) {
    %c0_i32 = arith.constant 0 : i32
    %c0_i32_0 = arith.constant 0 : i32
    %c0_i32_1 = arith.constant 0 : i32
    %c0_i32_2 = arith.constant 0 : i32
    return %c0_i32, %c0_i32_0, %c0_i32_1 : i32, i32, i32
  }
  func.func @transform_7(%arg0: i32) -> (i32, i32) {
    %c0_i32 = arith.constant 0 : i32
    %c0_i32_0 = arith.constant 0 : i32
    %c0_i32_1 = arith.constant 0 : i32
    return %c0_i32, %c0_i32_0 : i32, i32
  }
  func.func @transform_8(%arg0: i32) -> (i32, i32) {
    %c0_i32 = arith.constant 0 : i32
    %c0_i32_0 = arith.constant 0 : i32
    %c0_i32_1 = arith.constant 0 : i32
    return %c0_i32, %c0_i32_0 : i32, i32
  }
  func.func @transform_9(%arg0: i32) -> (i32, i32, i32) {
    %c0_i32 = arith.constant 0 : i32
    %c0_i32_0 = arith.constant 0 : i32
    %c0_i32_1 = arith.constant 0 : i32
    return %arg0, %c0_i32, %c0_i32_0 : i32, i32, i32
  }
}

</mosaic_0001>

<bundles_post_ra>
// kernel: tpu_custom_call.1
= control target key start
LH: loop header
LB: loop body
LE: loop exit
PB: predicated region body
PF: predicated region fallthrough
CT: control target
= control target key end

     0   :  { %s2509_s0 = inlined_call_operand.hbm [shape: f32[2,8,32], index: 0, kind: input, shape index: {}]   ;;  %s2510_s1 = inlined_call_operand.vmem [shape: bf16[2,32,96], index: 1, kind: input, shape index: {}]   ;;  %s2511_s2 = inlined_call_operand.hbm [shape: f32[2,1,96], index: 2, kind: input, shape index: {}]   ;;  %s2512_s3 = inlined_call_operand.vmem [shape: bf16[2,32,32], index: 3, kind: input, shape index: {}]   ;;  %s2513_s4 = inlined_call_operand.vmem [shape: bf16[2,32,64], index: 4, kind: input, shape index: {}]   ;;  %s2514_s5 = inlined_call_operand.vmem [shape: f32[2,1,64], index: 5, kind: input, shape index: {}]   ;;  %s2515_s6 = inlined_call_operand.vmem [shape: bf16[2,64,32], index: 6, kind: input, shape index: {}]   ;;  %s2516_s7 = inlined_call_operand.hbm [shape: bf16[32,32], index: 7, kind: input, shape index: {}]   ;;  %s2517_s8 = inlined_call_operand.hbm [shape: f32[16,32], index: 8, kind: input, shape index: {}]   ;;  %s2518_s9 = inlined_call_operand.hbm [shape: f32[2,8,32], index: 9, kind: output, shape index: {}]  }
   0x1   :  { %2528 = sst [smem:[#allocation15_spill]] %s2511_s2 }
   0x2   :  { %2529 = sst [smem:[#allocation16_spill]] %s2516_s7 }
   0x3   :  { %2530 = sst [smem:[#allocation17_spill]] %s2517_s8 }
   0x4   :  { %14 = vsyncpa [#allocation3], 0 }
   0x5   :  { %16 = vsyncpa [#allocation3 + $0x1], 0 }
   0x6   :  { %17 = vsyncpa [#allocation6], 0 }
   0x7   :  { %18 = vsyncpa [#allocation9], 0 }
   0x8   :  { %19 = vsyncpa [#allocation4], 0 }
   0x9   :  { %21 = vsyncpa [#allocation4 + $0x1], 0  ;;  %s2133_s30 = smov 0   ;;  %s2135_s10 = smov 0  }
   0xa   :  { %s2137_s11 = smov 0   ;;  %s2139_s12 = smov 0  }
   0xb LB: > { %s2531_s2 = sld [smem:[#allocation15_spill]]  ;;  %s2157_s16 = sadd.s32 4294967295, %s2057_s12   ;;  %s2057_s12 = sphi %s2139_s12, %s2553_s12   ;;  %s2053_s11 = sphi %s2137_s11, %s2552_s11   ;;  %s2049_s10 = sphi %s2135_s10, %s2551_s10   ;;  %s2045_s30 = sphi %s2133_s30, %s2550_s30  }
   0xc   : > { %p1529_p0 = scmp.ge.s32.totalorder %s2057_s12, 1  ;;  %p48_p1 = scmp.eq.s32.totalorder %s2157_s16, 0 }
   0xd   : > { %p252_p2 = scmp.lt.s32.totalorder %s2057_s12, 3  ;;  %s2059_s18 = smov [#allocation5]  }
   0xe   : > { %s268_s19 = sshll.u32 %s2059_s18, 4  ;;  %s2533_s7 = sld [smem:[#allocation16_spill]]  ;;  %s269_s19 = int_to_ptr.vmem [resolvable:$true] %s268_s19 }
   0xf   : > { %p2162_p3 = pnand %p1529_p0, %p252_p2  ;;  %s2060_s24 = smov [#allocation7]  }
  0x10   : > { %s294_s25 = sshll.u32 %s2060_s24, 4  ;;  %s2061_s26 = smov 16   ;;  %s295_s25 = int_to_ptr.vmem [resolvable:$true] %s294_s25 }
  0x11   : > { %s266_s15 = sshll.u32 %s2531_s2, 4  ;;  %p1718_p4 = pneg %p2162_p3  ;;  %s267_s15 = int_to_ptr.hbm [resolvable:$true] %s266_s15 }
  0x12   : > { %s2062_s27 = smov 1   ;;  %s2063_s28 = smov 64  }
  0x13   : > { %p2174_p6 = pnand %p1718_p4, %p48_p1  ;;  %s2064_s29 = smov 4  }
  0x14   : > { %s292_s22 = sshll.u32 %s2533_s7, 4  ;;  %s2535_s8 = sld [smem:[#allocation17_spill]]  ;;  %s293_s22 = int_to_ptr.hbm [resolvable:$true] %s292_s22 }
  0x15   : > { %1721 = dma.hbm_to_vmem [thread:$0]  (!%p2174_p6), %s267_s15, 32, %s269_s19, [#allocation6], %s2061_s26, %s2061_s26, %s2062_s27  }
  0x16   : > { %1724 = dma.hbm_to_vmem [thread:$0]  (!%p2174_p6), %s293_s22, 256, %s295_s25, [#allocation6], %s2063_s28, %s2063_s28, %s2064_s29  }
  0x17   : > { %s2065_s20 = smov [#allocation8]   ;;  %s2066_s19 = smov 128  }
  0x18   : > { %s308_s15 = sshll.u32 %s2065_s20, 4  ;;  %s2067_s21 = smov 8   ;;  %s309_s15 = int_to_ptr.vmem [resolvable:$true] %s308_s15 }
  0x19   : > { %s1528_s24 = sadd.s32 4294967294, %s2057_s12   ;;  %s2189_s22 = sadd.s32 1, %s2057_s12  }
  0x1a   : > { %s306_s18 = sshll.u32 %s2535_s8, 4  ;;  %s34_s25 = sadd.s32 1, %s2053_s11  ;;  %s307_s18 = int_to_ptr.hbm [resolvable:$true] %s306_s18 }
  0x1b   : > { %1727 = dma.hbm_to_vmem [thread:$0]  (!%p2174_p6), %s307_s18, 256, %s309_s15, [#allocation9], %s2066_s19, %s2066_s19, %s2067_s21  }
  0x1c   : > { %s31_s26 = ssub.s32 %s2057_s12, %s2189_s22  ;;  %p41_p7 = scmp.ne.s32.totalorder %s2053_s11, %s2049_s10 }
  0x1d   : > { %p32_p8 = scmp.eq.s32.totalorder %s31_s26, 0  ;;  %p42_p9 = scmp.eq.s32.totalorder %s2057_s12, 0 }
  0x1e   : > { %p47_p10 = scmp.ne.s32.totalorder %s2049_s10, %s2045_s30  ;;  %p239_p11 = scmp.eq.s32.totalorder %s2157_s16, 1 }
  0x1f   : > { %s2201_s27 = scalar_select %p32_p8, %s2053_s11, %s34_s25  }
  0x20   : > { %p2205_p12 = por %p48_p1, %p47_p10  ;;  %p2209_p13 = por %p239_p11, %p41_p7 }
  0x21   : > { %p245_p0 = scmp.eq.s32.totalorder %s1528_s24, 1  ;;  %p43_p2 = por %p42_p9, %p41_p7 }
  0x22   : > { %s322_s29 = sand.u32 1, %s2053_s11   ;;  %p1739_p6 = scmp.lt.s32.totalorder %s2057_s12, 2 }
  0x23   : > { %p2214_p4 = por %p245_p0, %p47_p10  ;;  %s1534_s14 = sshll.u32 %s322_s29, 3 }
  0x24   : > { %s1535_s18 = sshll.u32 %s2057_s12, 3  ;;  %s326_s25 = scalar_lea.vmem [#allocation2], %s1534_s14 }
  0x25   : > { %s330_s19 = scalar_lea.hbm %s2509_s0, %s1535_s18  ;;  %s334_s26 = sshll.u32 %s326_s25, 4  ;;  %s335_s26 = int_to_ptr.vmem [resolvable:$true] %s334_s26 }
  0x26   : > { %s332_s21 = sshll.u32 %s330_s19, 4  ;;  %p2223_p8 = pnand %p1739_p6, %p43_p2  ;;  %s333_s21 = int_to_ptr.hbm [resolvable:$true] %s332_s21 }
  0x27   : > { %s323_s2 = scalar_lea.sflag [#allocation3], %s322_s29  ;;  %s1953_s7 = sshra.s32 %s333_s21, 4  ;;  %s1954_s7 = int_to_ptr.hbm [resolvable:$true] %s1953_s7 }
  0x28   : > { %s1955_s8 = scalar_lea.hbm %s1954_s7, 8  ;;  %p1957_p9 = pneg %p2223_p8 }
  0x29   : > { %p1956_p7 = scmp.ne.s32.totalorder %s1954_s7, %s1955_s8  ;;  %s1960_s14 = scalar_lea.hbm %s2509_s0, 16 }
  0x2a   : > { %p1961_p0 = scmp.lt.s32.totalorder %s1954_s7, %s2509_s0  ;;  %p1962_p2 = scmp.lt.s32.totalorder %s1960_s14, %s1955_s8 }
  0x2b   : > { %p1958_p10 = pnand %p1957_p9, %p1956_p7 }
  0x2c   : > { %p1963_p6 = por %p1962_p2, %p1961_p0 }
  0x2d   : > { %p1959_p11 = pneg %p1958_p10 }
  0x2f   : > { %p1964_p5 = pnand %p1963_p6, %p1959_p11 }
  0x31   : > { %1967 = shalt.err (!%p1964_p5)
}
  0x32   : > { %1731 = dma.hbm_to_vmem [thread:$0]  (!%p2223_p8), %s333_s21, 128, %s335_s26, %s323_s2  }
  0x33   : > { %343 = sbr.rel (%p2162_p3) target bundleno = 4207 (0x106f), region = 56  ;;  %s2240_s29 = sand.u32 (!%p2162_p3), 1, %s2049_s10  }
  0x34   : > { %s2519_s25 = sshll.u32 (!%p2162_p3), %s2240_s29, 3  ;;  %s346_s18 = scalar_lea.sflag (!%p2162_p3), [#allocation3], %s2240_s29 }
  0x35   : > { %s349_s7 = scalar_lea.vmem (!%p2162_p3), [#allocation2], %s2519_s25 }
  0x38   : > { %2028 = dma.done.wait (%p2205_p12), %s346_s18, 128  }
  0x39   : > { %2030 = vsyncadd (%p2205_p12), %s346_s18, 4294967168 }
  0x3a   : > { %2032 = dma.done.wait (%p48_p1), [#allocation6], 288  }
  0x3b   : > { %2034 = vsyncadd (%p48_p1), [#allocation6], 4294967008 }
  0x3c   : > { %2036 = dma.done.wait (%p48_p1), [#allocation9], 256  }
  0x3d   : > { %2038 = vsyncadd (%p48_p1), [#allocation9], 4294967040  ;;  %v1681_v0 = vld [vmem:[%s2510_s1 + $0x8] sm:$0xff]  ;;  %v1680_v1 = vld [vmem:[%s2510_s1] sm:$0xff]  ;;  %vm423_vm0 = vcmask 261120   ;;  %s2068_s23 = smov 104  }
  0x3e   : > { %v2264_v2 = vld [vmem:[%s349_s7] sm:$0xff]  ;;  %433 = vmatpush.bf16.msra.mxu0 %v1681_v0  ;;  %v1800_v4 = vld [vmem:[#allocation5] ss:$0 sm:$0xff]  ;;  %s2069_s26 = smov 120   ;;  %s2070_s24 = smov 96   ;;  %vm446_vm1 = vcmask 64512  }
  0x3f   : > { %v402_v3 = vpack.c.bf16 %v2264_v2, %v2264_v2  ;;  %s2071_s20 = smov 80   ;;  %s2072_s14 = smov 72   ;;  %vm484_vm2 = vcmask 1043456   ;;  %vm685_vm3 = vcmask 130048   ;;  %vm687_vm4 = vcmask 195584  }
  0x40   : > { %s2073_s15 = smov 88   ;;  %s2527_s19 = smov 112   ;;  %vm833_vm9 = vcmask 523264  }
  0x41   : > { %s2521_s18 = smov 64   ;;  %s2520_s7 = smov 40  }
  0x42   : > { %434 = vmatpush.bf16.msra.mxu0 %v1680_v1  ;;  %s2523_s2 = smov 56   ;;  %s2522_s8 = smov 48  }
  0x43   : > { %s2526_s17 = smov 8   ;;  %s2525_s21 = smov 16  }
  0x44   : > { %s2524_s25 = smov 24  }
  0x45   : > { %1550 = vmatmul.msk.bf16.vlgmr.msra.gmra.mxu0 %vm423_vm0, %v402_v3 }
  0xc2   : > { %v436_v5 = vpop.f32.mrf.mxu0 }
  0xc3   : > { %v437_v6 = vadd.f32 %v1800_v4, %v436_v5 }
  0xc5   : > { %v440_v7 = vpack.c.bf16 %v437_v6, %v437_v6 }
  0xc7   : > { %v442_v8 = vunpack.c.l.b16 %v440_v7 }
  0xc9   : > { %v2269_v9 = vpack.c.b16 %v442_v8, %v442_v8 }
  0xca   : > { %v438_v10 = vpop.f32.mrf.mxu0 }
  0xcb   : > { %615 = vrot.lane.b32.xlu2 %v2269_v9, %s2068_s23  ;;  %501 = vrot.lane.b32.xlu1 %v2269_v9, %s2069_s26 }
  0xcc   : > { %444 = vrot.lane.b32.xlu0 %v2269_v9, %s2070_s24 }
  0xd3   : > { %560 = vrot.lane.b32.xlu2 %v2269_v9, %s2071_s20  ;;  %617 = vrot.lane.b32.xlu1 %v2269_v9, %s2072_s14 }
  0xd4   : > { %503 = vrot.lane.b32.xlu0 %v2269_v9, %s2073_s15 }
  0xdc   : > { %558 = vrot.lane.b32.xlu0 %v2269_v9, %s2527_s19 }
 0x125   : > { %v616_v11 = vpop.permute.xlu2 %615 }
 0x12d   : > { %v561_v12 = vpop.permute.xlu2 %560 }
 0x12e   : > { %v566_v13 = vsel %vm446_vm1, %v561_v12, 0 }
 0x12f   : > { %575 = vmatpush.bf16.xpose.msrb.mxu0 %v566_v13 }
 0x13d   : > { %v502_v14 = vpop.permute.xlu1 %501 }
 0x13e   : > { %v445_v15 = vpop.permute.xlu0 %444 }
 0x13f   : > { %v451_v16 = vsel %vm446_vm1, %v445_v15, 0 }
 0x140   : > { %460 = vmatpush.bf16.xpose.msra.mxu1 %v451_v16 }
 0x145   : > { %v618_v17 = vpop.permute.xlu1 %617 }
 0x146   : > { %v504_v18 = vpop.permute.xlu0 %503  ;;  %v623_v19 = vsel %vm446_vm1, %v618_v17, 0 }
 0x147   : > { %1551 = vmatmul.msk.bf16.vlgmr.msra.gmra.mxu1 %vm446_vm1, %v440_v7  ;;  %v509_v20 = vsel %vm446_vm1, %v504_v18, 0 }
 0x148   : > { %518 = vmatpush.bf16.xpose.msra.mxu3 %v509_v20 }
 0x14e   : > { %v559_v21 = vpop.permute.xlu0 %558 }
 0x14f   : > { %1553 = vmatmul.msk.bf16.vlgmr.msra.gmra.mxu3 %vm446_vm1, %v502_v14  ;;  %1555 = vmatmul.msk.bf16.vlgmr.msrb.gmra.mxu0 %vm446_vm1, %v559_v21 }
 0x150   : > { %632 = vmatpush.bf16.xpose.msrb.mxu3 %v623_v19 }
 0x15f   : > { %1557 = vmatmul.msk.bf16.vlgmr.msrb.gmra.mxu3 %vm446_vm1, %v616_v11 }
 0x1c4   : > { %v462_v22 = vpop.f32.mrf.mxu1 }
 0x1c5   : > { %v466_v23 = vmul.f32 0.35355338, %v462_v22 }
 0x1c7   : > { %v467_v24 = vsel %vm446_vm1, %v466_v23, -inf }
 0x1c8   : > { %468 = vmax.xlane.f32.xlu1 %v467_v24 }
 0x1cc   : > { %v464_v25 = vpop.f32.mrf.mxu1  ;;  %v577_v26 = vpop.f32.mrf.mxu0 }
 0x1cd   : > { %v581_v31 = vmul.f32 0.35355338, %v577_v26 }
 0x1cf   : > { %v582_v33 = vsel %vm446_vm1, %v581_v31, -inf }
 0x1d2   : > { %v520_v27 = vpop.f32.mrf.mxu3 }
 0x1d3   : > { %v524_v28 = vmul.f32 0.35355338, %v520_v27  ;;  %v1683_v27 = vld [vmem:[%s2512_s3 + $0x8] sm:$0xff] }
 0x1d4   : > { %v579_v29 = vpop.f32.mrf.mxu0  ;;  %717 = vmatpush.bf16.msra.mxu0 %v1683_v27 }
 0x1d5   : > { %v525_v30 = vsel %vm446_vm1, %v524_v28, -inf }
 0x1d6   : > { %526 = vmax.xlane.f32.xlu2 %v525_v30 }
 0x1da   : > { %v522_v32 = vpop.f32.mrf.mxu3 }
 0x1de   : > { %583 = vmax.xlane.f32.xlu2 %v582_v33 }
 0x1e2   : > { %v634_v34 = vpop.f32.mrf.mxu3 }
 0x1e3   : > { %v638_v35 = vmul.f32 0.35355338, %v634_v34 }
 0x1e5   : > { %v639_v36 = vsel %vm446_vm1, %v638_v35, -inf }
 0x1e6   : > { %640 = vmax.xlane.f32.xlu0 %v639_v36  ;;  %v1801_v36 = vld [vmem:[#allocation8] ss:$0 sm:$0xff] }
 0x1ea   : > { %v636_v37 = vpop.f32.mrf.mxu3 }
 0x1f6   : > { %479 = vrot.lane.b32.xlu2 %v2269_v9, %s2521_s18 }
 0x1fe   : > { %651 = vrot.lane.b32.xlu2 %v2269_v9, %s2520_s7 }
 0x23b   : > { %v469_v38 = vpop.xlane.xlu1 %468 }
 0x23c   : > { %v470_v39 = vsub.f32 %v466_v23, %v469_v38 }
 0x23e   : > { %v471_v40 = vmul.f32 1.442695, %v470_v39 }
 0x240   : > { %1819 = vpow2.f32 %v471_v40 }
 0x246   : > { %v1820_v41 = vpop.eup %1819 }
 0x247   : > { %v473_v42 = vsel %vm446_vm1, %v1820_v41, 0.0 }
 0x248   : > { %474 = vadd.xlane.f32.xlu1 %v473_v42  ;;  %v2082_v42 = vmov 32.0  }
 0x249   : > { %v527_v43 = vpop.xlane.xlu2 %526 }
 0x24a   : > { %v528_v46 = vsub.f32 %v524_v28, %v527_v43  ;;  %v1682_v28 = vld [vmem:[%s2512_s3] sm:$0xff] }
 0x24b   : > { %718 = vmatpush.bf16.msra.mxu0 %v1682_v28 }
 0x24c   : > { %v529_v48 = vmul.f32 1.442695, %v528_v46 }
 0x251   : > { %v584_v44 = vpop.xlane.xlu2 %583 }
 0x252   : > { %v585_v45 = vsub.f32 %v581_v31, %v584_v44 }
 0x254   : > { %v586_v47 = vmul.f32 1.442695, %v585_v45 }
 0x256   : > { %1821 = vpow2.f32 %v586_v47 }
 0x257   : > { %1823 = vpow2.f32 %v529_v48 }
 0x259   : > { %v480_v49 = vpop.permute.xlu2 %479  ;;  %v641_v50 = vpop.xlane.xlu0 %640 }
 0x25a   : > { %v486_v51 = vsel %vm484_vm2, %v480_v49, 0  ;;  %v642_v53 = vsub.f32 %v638_v35, %v641_v50 }
 0x25b   : > { %495 = vmatpush.bf16.msra.mxu2 %v486_v51 }
 0x25c   : > { %v1822_v52 = vpop.eup %1821  ;;  %v643_v55 = vmul.f32 1.442695, %v642_v53  ;;  %v1685_v53 = vld [vmem:[%s2513_s4 + $0x8] sm:$0xff] }
 0x25d   : > { %v588_v54 = vsel %vm446_vm1, %v1822_v52, 0.0  ;;  %v1824_v56 = vpop.eup %1823 }
 0x25e   : > { %589 = vadd.xlane.f32.xlu0 %v588_v54  ;;  %1825 = vpow2.f32 %v643_v55  ;;  %v531_v57 = vsel %vm446_vm1, %v1824_v56, 0.0  ;;  %v1684_v54 = vld [vmem:[%s2513_s4] sm:$0xff]  ;;  %v1689_v55 = vld [vmem:[%s2515_s6 + $0x18] sm:$0xff] }
 0x25f   : > { %841 = vmatpush.bf16.msra.mxu3 %v1689_v55 }
 0x261   : > { %537 = vrot.lane.b32.xlu1 %v2269_v9, %s2523_s2  ;;  %v652_v1 = vpop.permute.xlu2 %651  ;;  %s2003_s2 = scalar_lea.hbm %s2518_s9, 16 }
 0x262   : > { %v657_v5 = vsel %vm484_vm2, %v652_v1, 0 }
 0x264   : > { %v1826_v58 = vpop.eup %1825 }
 0x265   : > { %v645_v59 = vsel %vm446_vm1, %v1826_v58, 0.0 }
 0x266   : > { %532 = vadd.xlane.f32.xlu0 %v531_v57 }
 0x26e   : > { %646 = vadd.xlane.f32.xlu0 %v645_v59 }
 0x282   : > { %594 = vrot.lane.b32.xlu0 %v2269_v9, %s2522_s8 }
 0x2bb   : > { %v475_v60 = vpop.xlane.xlu1 %474 }
 0x2bc   : > { %1827 = vrcp.f32 %v475_v60 }
 0x2c2   : > { %v1828_v61 = vpop.eup %1827 }
 0x2c3   : > { %v477_v62 = vmul.f32 %v1828_v61, %v1820_v41 }
 0x2c5   : > { %v478_v63 = vpack.c.bf16 %v477_v62, %v477_v62 }
 0x2c7   : > { %1552 = vmatmul.msk.bf16.vlgmr.msra.gmra.mxu2 %vm446_vm1, %v478_v63 }
 0x2d1   : > { %v590_v0 = vpop.xlane.xlu0 %589 }
 0x2d3   : > { %v538_v3 = vpop.permute.xlu1 %537 }
 0x2d4   : > { %v543_v4 = vsel %vm484_vm2, %v538_v3, 0  ;;  %v1802_v3 = vld [vmem:[#allocation8 + $0x2] ss:$0 sm:$0xff] }
 0x2d5   : > { %552 = vmatpush.bf16.msrb.mxu2 %v543_v4 }
 0x2d9   : > { %666 = vmatpush.bf16.msra.mxu2 %v657_v5  ;;  %v533_v6 = vpop.xlane.xlu0 %532  ;;  %v1803_v5 = vld [vmem:[#allocation8 + $0x3] ss:$0 sm:$0xff] }
 0x2da   : > { %1829 = vrcp.f32 %v533_v6 }
 0x2e0   : > { %v1830_v7 = vpop.eup %1829 }
 0x2e1   : > { %v535_v8 = vmul.f32 %v1830_v7, %v1824_v56  ;;  %v647_v9 = vpop.xlane.xlu0 %646 }
 0x2e2   : > { %1831 = vrcp.f32 %v647_v9 }
 0x2e3   : > { %v536_v10 = vpack.c.bf16 %v535_v8, %v535_v8  ;;  %1833 = vrcp.f32 %v590_v0 }
 0x2e4   : > { %1835 = vrcp.f32 %v2082_v42  ;;  %v1807_v42 = vld [vmem:[#allocation8 + $0x5] ss:$0 sm:$0xff] }
 0x2e5   : > { %1554 = vmatmul.msk.bf16.vlgmr.msrb.gmra.mxu2 %vm446_vm1, %v536_v10  ;;  %v1687_v10 = vld [vmem:[%s2515_s6 + $0x8] sm:$0xff] }
 0x2e8   : > { %v1832_v11 = vpop.eup %1831 }
 0x2e9   : > { %v649_v12 = vmul.f32 %v1832_v11, %v1826_v58  ;;  %v1834_v13 = vpop.eup %1833  ;;  %v1688_v58 = vld [vmem:[%s2515_s6 + $0x10] sm:$0xff]  ;;  %v1686_v11 = vld [vmem:[%s2515_s6] sm:$0xff] }
 0x2ea   : > { %v592_v14 = vmul.f32 %v1834_v13, %v1822_v52  ;;  %v1836_v43 = vpop.eup %1835  ;;  %842 = vmatpush.bf16.msra.mxu3 %v1688_v58 }
 0x2eb   : > { %v650_v15 = vpack.c.bf16 %v649_v12, %v649_v12  ;;  %v731_v44 = vmul.f32 32.0, %v1836_v43  ;;  %vm735_vm5 = vweird.f32 %v1836_v43  ;;  %v1804_v12 = vld [vmem:[%s2514_s5] ss:$0 sm:$0xff] }
 0x2ec   : > { %v593_v18 = vpack.c.bf16 %v592_v14, %v592_v14 }
 0x2ed   : > { %v732_v45 = vsub.f32 1.0, %v731_v44 }
 0x2ee   : > { %843 = vmatpush.bf16.msra.mxu3 %v1687_v10 }
 0x2ef   : > { %v733_v46 = vmul.f32 %v1836_v43, %v732_v45 }
 0x2f1   : > { %v734_v47 = vadd.f32 %v1836_v43, %v733_v46 }
 0x2f2   : > { %844 = vmatpush.bf16.msra.mxu3 %v1686_v11 }
 0x2f3   : > { %v2332_v48 = vsel %vm735_vm5, %v1836_v43, %v734_v47  ;;  %v1808_v47 = vld [vmem:[#allocation5 + $0x1] ss:$0 sm:$0xff] }
 0x2f4   : > { %v595_v16 = vpop.permute.xlu0 %594 }
 0x2f5   : > { %1558 = vmatmul.msk.bf16.vlgmr.msra.gmra.mxu2 %vm446_vm1, %v650_v15  ;;  %v600_v17 = vsel %vm484_vm2, %v595_v16, 0 }
 0x2f6   : > { %609 = vmatpush.bf16.msrb.mxu1 %v600_v17 }
 0x2f9   : > { %1556 = vmatmul.msk.bf16.vlgmr.msrb.gmra.mxu1 %vm446_vm1, %v593_v18  ;;  %v1805_v18 = vld [vmem:[#allocation8 + $0x1] ss:$0 sm:$0xff] }
 0x2fa   : > { %790 = vmatpush.bf16.msra.mxu1 %v1685_v53 }
 0x2fe   : > { %791 = vmatpush.bf16.msra.mxu1 %v1684_v54 }
 0x34a   : > { %v497_v19 = vpop.f32.mrf.mxu2 }
 0x352   : > { %v499_v20 = vpop.f32.mrf.mxu2 }
 0x368   : > { %v554_v21 = vpop.f32.mrf.mxu2 }
 0x369   : > { %673 = vrot.lane.b32.xlu1 %v554_v21, %s2526_s17  ;;  %s2540_s17 = smov 112  }
 0x370   : > { %v556_v22 = vpop.f32.mrf.mxu2 }
 0x376   : > { %v611_v23 = vpop.f32.mrf.mxu1 }
 0x377   : > { %677 = vrot.lane.b32.xlu2 %v611_v23, %s2525_s21  ;;  %s2547_s21 = smov 24  }
 0x378   : > { %v668_v24 = vpop.f32.mrf.mxu2 }
 0x379   : > { %681 = vrot.lane.b32.xlu1 %v668_v24, %s2524_s25  ;;  %s1677_s25 = sshll.u32 %s2157_s16, 3 }
 0x37e   : > { %v613_v25 = vpop.f32.mrf.mxu1 }
 0x380   : > { %v670_v26 = vpop.f32.mrf.mxu2 }
 0x3d1   : > { %v678_v31 = vpop.permute.xlu2 %677 }
 0x3db   : > { %v674_v29 = vpop.permute.xlu1 %673 }
 0x3dc   : > { %v684_v30 = vsel %vm446_vm1, %v497_v19, %v674_v29  ;;  %v1691_v29 = vld [vmem:[%s2510_s1 + $0x18] sm:$0xff] }
 0x3dd   : > { %v686_v33 = vsel %vm685_vm3, %v684_v30, %v678_v31  ;;  %911 = vmatpush.bf16.msrb.mxu2 %v1691_v29  ;;  %v1690_v30 = vld [vmem:[%s2510_s1 + $0x10] sm:$0xff] }
 0x3e1   : > { %912 = vmatpush.bf16.msrb.mxu2 %v1690_v30 }
 0x3eb   : > { %v682_v32 = vpop.permute.xlu1 %681 }
 0x3ec   : > { %v688_v34 = vsel %vm687_vm4, %v686_v33, %v682_v32 }
 0x3ed   : > { %v689_v35 = vpack.c.bf16 %v688_v34, %v688_v34 }
 0x3ef   : > { %1567 = vmatmul.msk.bf16.vlgmr.msra.gmra.mxu0 %vm423_vm0, %v689_v35 }
 0x46c   : > { %v720_v37 = vpop.f32.mrf.mxu0 }
 0x46d   : > { %v721_v38 = vadd.f32 %v1801_v36, %v720_v37 }
 0x46f   : > { %v724_v39 = vadd.f32 %v721_v38, %v2264_v2 }
 0x471   : > { %v727_v40 = vsel %vm423_vm0, %v724_v39, 0.0 }
 0x472   : > { %728 = vadd.xlane.f32.xlu2 %v727_v40  ;;  %v1806_v40 = vld [vmem:[#allocation8 + $0x4] ss:$0 sm:$0xff] }
 0x474   : > { %v722_v41 = vpop.f32.mrf.mxu0 }
 0x4e5   : > { %v729_v49 = vpop.xlane.xlu2 %728 }
 0x4e6   : > { %v737_v50 = vmul.f32 %v2332_v48, %v729_v49 }
 0x4e8   : > { %v738_v51 = vsub.f32 %v724_v39, %v737_v50 }
 0x4ea   : > { %v739_v52 = vmul.f32 %v738_v51, %v738_v51 }
 0x4ec   : > { %v740_v2 = vsel %vm423_vm0, %v739_v52, 0.0 }
 0x4ed   : > { %741 = vadd.xlane.f32.xlu1 %v740_v2 }
 0x560   : > { %v742_v56 = vpop.xlane.xlu1 %741 }
 0x561   : > { %v743_v57 = vmul.f32 %v742_v56, %v2332_v48 }
 0x563   : > { %v744_v59 = vadd.f32 1e-05, %v743_v57 }
 0x565   : > { %1837 = vrsqrt.f32 %v744_v59  ;;  %vm751_vm7 = vweird.f32 %v744_v59 }
 0x56b   : > { %v1838_v60 = vpop.eup %1837 }
 0x56c   : > { %v746_v61 = vmul.f32 %v1838_v60, %v744_v59  ;;  %vm752_vm6 = vweird.f32 %v1838_v60 }
 0x56d   : > { %vm753_vm8 = vmor %vm751_vm7, %vm752_vm6 }
 0x56e   : > { %v747_v62 = vmul.f32 %v1838_v60, %v746_v61 }
 0x570   : > { %v748_v63 = vmul.f32 0.5, %v747_v62 }
 0x572   : > { %v749_v0 = vsub.f32 1.5, %v748_v63 }
 0x574   : > { %v750_v1 = vmul.f32 %v1838_v60, %v749_v0 }
 0x576   : > { %v754_v4 = vsel %vm753_vm8, %v1838_v60, %v750_v1 }
 0x577   : > { %v755_v6 = vmul.f32 %v754_v4, %v738_v51 }
 0x579   : > { %v757_v7 = vmul.f32 %v1802_v3, %v755_v6 }
 0x57b   : > { %v759_v8 = vadd.f32 %v1803_v5, %v757_v7 }
 0x57d   : > { %v760_v9 = vpack.c.bf16 %v759_v8, %v759_v8 }
 0x57f   : > { %1576 = vmatmul.msk.bf16.vlgmr.msra.gmra.mxu1 %vm423_vm0, %v760_v9 }
 0x5fc   : > { %v793_v13 = vpop.f32.mrf.mxu1 }
 0x5fd   : > { %v794_v14 = vadd.f32 %v1804_v12, %v793_v13 }
 0x5ff   : > { %v797_v15 = vmax.f32 %v794_v14, 0.0 }
 0x601   : > { %v798_v16 = vpack.c.bf16 %v797_v15, %v797_v15 }
 0x603   : > { %1593 = vmatmul.msk.bf16.vlgmr.msra.gmra.mxu3 %vm833_vm9, %v798_v16 }
 0x604   : > { %v795_v17 = vpop.f32.mrf.mxu1 }
 0x686   : > { %v846_v19 = vpop.f32.mrf.mxu3 }
 0x687   : > { %v847_v20 = vadd.f32 %v1805_v18, %v846_v19 }
 0x689   : > { %v850_v21 = vadd.f32 %v847_v20, %v759_v8 }
 0x68b   : > { %v853_v22 = vsel %vm423_vm0, %v850_v21, 0.0 }
 0x68c   : > { %854 = vadd.xlane.f32.xlu0 %v853_v22 }
 0x68e   : > { %v848_v23 = vpop.f32.mrf.mxu3 }
 0x6ff   : > { %v855_v24 = vpop.xlane.xlu0 %854 }
 0x700   : > { %v856_v25 = vmul.f32 %v855_v24, %v2332_v48 }
 0x702   : > { %v857_v26 = vsub.f32 %v850_v21, %v856_v25 }
 0x704   : > { %v858_v27 = vmul.f32 %v857_v26, %v857_v26 }
 0x706   : > { %v859_v28 = vsel %vm423_vm0, %v858_v27, 0.0 }
 0x707   : > { %860 = vadd.xlane.f32.xlu2 %v859_v28 }
 0x77a   : > { %v861_v31 = vpop.xlane.xlu2 %860 }
 0x77b   : > { %v862_v32 = vmul.f32 %v861_v31, %v2332_v48 }
 0x77d   : > { %v863_v33 = vadd.f32 1e-05, %v862_v32 }
 0x77f   : > { %1839 = vrsqrt.f32 %v863_v33  ;;  %vm870_vm11 = vweird.f32 %v863_v33 }
 0x785   : > { %v1840_v34 = vpop.eup %1839 }
 0x786   : > { %v865_v35 = vmul.f32 %v1840_v34, %v863_v33  ;;  %vm871_vm10 = vweird.f32 %v1840_v34 }
 0x787   : > { %vm872_vm12 = vmor %vm870_vm11, %vm871_vm10 }
 0x788   : > { %v866_v36 = vmul.f32 %v1840_v34, %v865_v35 }
 0x78a   : > { %v867_v37 = vmul.f32 0.5, %v866_v36 }
 0x78c   : > { %v868_v38 = vsub.f32 1.5, %v867_v37 }
 0x78e   : > { %v869_v39 = vmul.f32 %v1840_v34, %v868_v38 }
 0x790   : > { %v873_v41 = vsel %vm872_vm12, %v1840_v34, %v869_v39 }
 0x791   : > { %v874_v43 = vmul.f32 %v873_v41, %v857_v26 }
 0x793   : > { %v876_v44 = vmul.f32 %v1806_v40, %v874_v43 }
 0x795   : > { %v2370_v45 = vadd.f32 %v1807_v42, %v876_v44 }
 0x797   : > { %v879_v46 = vpack.c.bf16 %v2370_v45, %v2370_v45 }
 0x799   : > { %1606 = vmatmul.msk.bf16.vlgmr.msrb.gmra.mxu2 %vm423_vm0, %v879_v46 }
 0x81c   : > { %v914_v49 = vpop.f32.mrf.mxu2 }
 0x81d   : > { %v915_v50 = vadd.f32 %v1808_v47, %v914_v49 }
 0x81f   : > { %v918_v51 = vpack.c.bf16 %v915_v50, %v915_v50 }
 0x821   : > { %v920_v52 = vunpack.c.l.b16 %v918_v51 }
 0x823   : > { %v2375_v2 = vpack.c.b16 %v920_v52, %v920_v52 }
 0x824   : > { %v916_v53 = vpop.f32.mrf.mxu2 }
 0x825   : > { %922 = vrot.lane.b32.xlu2 %v2375_v2, %s2070_s24  ;;  %977 = vrot.lane.b32.xlu0 %v2375_v2, %s2069_s26  ;;  %s2542_s26 = smov 48   ;;  %s2543_s24 = smov 64  }
 0x826   : > { %979 = vrot.lane.b32.xlu1 %v2375_v2, %s2073_s15  ;;  %s2546_s15 = smov 16  }
 0x82d   : > { %1036 = vrot.lane.b32.xlu2 %v2375_v2, %s2071_s20  ;;  %1093 = vrot.lane.b32.xlu0 %v2375_v2, %s2072_s14  ;;  %s2544_s20 = smov 40   ;;  %s2545_s14 = smov 8  }
 0x82e   : > { %1091 = vrot.lane.b32.xlu1 %v2375_v2, %s2068_s23  ;;  %s2541_s23 = smov 56  }
 0x835   : > { %1034 = vrot.lane.b32.xlu0 %v2375_v2, %s2540_s17 }
 0x87f   : > { %v923_v54 = vpop.permute.xlu2 %922 }
 0x880   : > { %v928_v55 = vsel %vm446_vm1, %v923_v54, 0 }
 0x881   : > { %937 = vmatpush.bf16.xpose.msrb.mxu0 %v928_v55 }
 0x887   : > { %v1037_v56 = vpop.permute.xlu2 %1036 }
 0x888   : > { %v1042_v57 = vsel %vm446_vm1, %v1037_v56, 0  ;;  %1607 = vmatmul.msk.bf16.vlgmr.msrb.gmra.mxu0 %vm446_vm1, %v918_v51 }
 0x889   : > { %1051 = vmatpush.bf16.xpose.msra.mxu0 %v1042_v57 }
 0x897   : > { %v978_v58 = vpop.permute.xlu0 %977 }
 0x898   : > { %v980_v59 = vpop.permute.xlu1 %979 }
 0x899   : > { %v985_v60 = vsel %vm446_vm1, %v980_v59, 0 }
 0x89a   : > { %994 = vmatpush.bf16.xpose.msrb.mxu3 %v985_v60 }
 0x89f   : > { %v1094_v61 = vpop.permute.xlu0 %1093 }
 0x8a0   : > { %v1099_v62 = vsel %vm446_vm1, %v1094_v61, 0  ;;  %v1092_v0 = vpop.permute.xlu1 %1091 }
 0x8a1   : > { %1609 = vmatmul.msk.bf16.vlgmr.msrb.gmra.mxu3 %vm446_vm1, %v978_v58 }
 0x8a2   : > { %1108 = vmatpush.bf16.xpose.msra.mxu3 %v1099_v62 }
 0x8a7   : > { %v1035_v63 = vpop.permute.xlu0 %1034 }
 0x8a8   : > { %1611 = vmatmul.msk.bf16.vlgmr.msra.gmra.mxu0 %vm446_vm1, %v1035_v63 }
 0x8b1   : > { %1613 = vmatmul.msk.bf16.vlgmr.msra.gmra.mxu3 %vm446_vm1, %v1092_v0 }
 0x905   : > { %v939_v1 = vpop.f32.mrf.mxu0 }
 0x906   : > { %v943_v3 = vmul.f32 0.35355338, %v939_v1 }
 0x908   : > { %v944_v4 = vsel %vm446_vm1, %v943_v3, -inf }
 0x909   : > { %945 = vmax.xlane.f32.xlu2 %v944_v4 }
 0x90d   : > { %v941_v5 = vpop.f32.mrf.mxu0 }
 0x924   : > { %v996_v6 = vpop.f32.mrf.mxu3 }
 0x925   : > { %v1000_v7 = vmul.f32 0.35355338, %v996_v6  ;;  %v1053_v8 = vpop.f32.mrf.mxu0 }
 0x926   : > { %v1057_v10 = vmul.f32 0.35355338, %v1053_v8  ;;  %v1693_v8 = vld [vmem:[%s2512_s3 + $0x18] sm:$0xff] }
 0x927   : > { %v1001_v9 = vsel %vm446_vm1, %v1000_v7, -inf  ;;  %1192 = vmatpush.bf16.msrb.mxu0 %v1693_v8 }
 0x928   : > { %1002 = vmax.xlane.f32.xlu1 %v1001_v9  ;;  %v1058_v13 = vsel %vm446_vm1, %v1057_v10, -inf  ;;  %v1692_v9 = vld [vmem:[%s2512_s3 + $0x10] sm:$0xff] }
 0x92b   : > { %1193 = vmatpush.bf16.msrb.mxu0 %v1692_v9 }
 0x92c   : > { %v998_v11 = vpop.f32.mrf.mxu3 }
 0x92d   : > { %v1055_v12 = vpop.f32.mrf.mxu0 }
 0x930   : > { %1059 = vmax.xlane.f32.xlu1 %v1058_v13 }
 0x934   : > { %v1110_v14 = vpop.f32.mrf.mxu3 }
 0x935   : > { %v1114_v15 = vmul.f32 0.35355338, %v1110_v14 }
 0x937   : > { %v1115_v16 = vsel %vm446_vm1, %v1114_v15, -inf }
 0x938   : > { %1116 = vmax.xlane.f32.xlu0 %v1115_v16 }
 0x93c   : > { %v1112_v17 = vpop.f32.mrf.mxu3 }
 0x93d   : > { %v1809_v17 = vld [vmem:[#allocation8 + $0x6] ss:$0 sm:$0xff] }
 0x949   : > { %1013 = vrot.lane.b32.xlu1 %v2375_v2, %s2541_s23  ;;  %s1424_s23 = scalar_lea.hbm %s2518_s9, %s1677_s25 }
 0x951   : > { %1070 = vrot.lane.b32.xlu1 %v2375_v2, %s2542_s26  ;;  %s2548_s26 = sshll.u32 %s2240_s29, 3 }
 0x97c   : > { %v946_v18 = vpop.xlane.xlu2 %945 }
 0x97d   : > { %v947_v19 = vsub.f32 %v943_v3, %v946_v18 }
 0x97f   : > { %v948_v20 = vmul.f32 1.442695, %v947_v19 }
 0x981   : > { %1841 = vpow2.f32 %v948_v20 }
 0x987   : > { %v1842_v21 = vpop.eup %1841 }
 0x988   : > { %v950_v22 = vsel %vm446_vm1, %v1842_v21, 0.0 }
 0x989   : > { %951 = vadd.xlane.f32.xlu0 %v950_v22 }
 0x99b   : > { %v1003_v23 = vpop.xlane.xlu1 %1002 }
 0x99c   : > { %v1004_v24 = vsub.f32 %v1000_v7, %v1003_v23 }
 0x99e   : > { %v1005_v25 = vmul.f32 1.442695, %v1004_v24 }
 0x9a0   : > { %1843 = vpow2.f32 %v1005_v25 }
 0x9a3   : > { %v1060_v26 = vpop.xlane.xlu1 %1059 }
 0x9a4   : > { %v1061_v27 = vsub.f32 %v1057_v10, %v1060_v26 }
 0x9a6   : > { %v1844_v28 = vpop.eup %1843  ;;  %v1062_v29 = vmul.f32 1.442695, %v1061_v27 }
 0x9a7   : > { %v1007_v30 = vsel %vm446_vm1, %v1844_v28, 0.0 }
 0x9a8   : > { %1845 = vpow2.f32 %v1062_v29  ;;  %1008 = vadd.xlane.f32.xlu2 %v1007_v30  ;;  %v1699_v29 = vld [vmem:[%s2515_s6 + $0x38] sm:$0xff] }
 0x9a9   : > { %1311 = vmatpush.bf16.msrb.mxu3 %v1699_v29 }
 0x9ab   : > { %v1117_v31 = vpop.xlane.xlu0 %1116 }
 0x9ac   : > { %v1118_v32 = vsub.f32 %v1114_v15, %v1117_v31 }
 0x9ae   : > { %v1846_v33 = vpop.eup %1845  ;;  %v1119_v34 = vmul.f32 1.442695, %v1118_v32  ;;  %v1698_v32 = vld [vmem:[%s2515_s6 + $0x30] sm:$0xff] }
 0x9af   : > { %v1064_v35 = vsel %vm446_vm1, %v1846_v33, 0.0  ;;  %1312 = vmatpush.bf16.msrb.mxu3 %v1698_v32 }
 0x9b0   : > { %1847 = vpow2.f32 %v1119_v34  ;;  %1065 = vadd.xlane.f32.xlu0 %v1064_v35 }
 0x9b6   : > { %v1848_v36 = vpop.eup %1847 }
 0x9b7   : > { %v1121_v37 = vsel %vm446_vm1, %v1848_v36, 0.0 }
 0x9b8   : > { %1122 = vadd.xlane.f32.xlu0 %v1121_v37 }
 0x9bb   : > { %v1014_v38 = vpop.permute.xlu1 %1013 }
 0x9bc   : > { %v1019_v39 = vsel %vm484_vm2, %v1014_v38, 0 }
 0x9bd   : > { %1028 = vmatpush.bf16.msra.mxu2 %v1019_v39 }
 0x9c0   : > { %956 = vrot.lane.b32.xlu2 %v2375_v2, %s2543_s24  ;;  %s399_s24 = scalar_lea.vmem [#allocation10], %s2548_s26 }
 0x9c3   : > { %v1071_v44 = vpop.permute.xlu1 %1070 }
 0x9c4   : > { %v1076_v51 = vsel %vm484_vm2, %v1071_v44, 0 }
 0x9cc   : > { %1127 = vrot.lane.b32.xlu0 %v2375_v2, %s2544_s20  ;;  %s1426_s20 = sshll.u32 %s399_s24, 4  ;;  %s1427_s20 = int_to_ptr.vmem [resolvable:$true] %s1426_s20 }
 0x9fc   : > { %v952_v40 = vpop.xlane.xlu0 %951 }
 0x9fd   : > { %1849 = vrcp.f32 %v952_v40  ;;  %v1810_v40 = vld [vmem:[#allocation8 + $0x8] ss:$0 sm:$0xff] }
 0xa03   : > { %v1850_v42 = vpop.eup %1849 }
 0xa04   : > { %v954_v46 = vmul.f32 %v1850_v42, %v1842_v21  ;;  %v1811_v42 = vld [vmem:[#allocation8 + $0x9] ss:$0 sm:$0xff] }
 0xa06   : > { %v955_v53 = vpack.c.bf16 %v954_v46, %v954_v46 }
 0xa1b   : > { %v1009_v41 = vpop.xlane.xlu2 %1008 }
 0xa1c   : > { %1851 = vrcp.f32 %v1009_v41 }
 0xa22   : > { %v1852_v43 = vpop.eup %1851 }
 0xa23   : > { %v1011_v47 = vmul.f32 %v1852_v43, %v1844_v28  ;;  %v957_v49 = vpop.permute.xlu2 %956  ;;  %v1066_v54 = vpop.xlane.xlu0 %1065  ;;  %v1695_v28 = vld [vmem:[%s2513_s4 + $0x18] sm:$0xff] }
 0xa24   : > { %v962_v50 = vsel %vm484_vm2, %v957_v49, 0  ;;  %1853 = vrcp.f32 %v1066_v54  ;;  %v1697_v49 = vld [vmem:[%s2515_s6 + $0x28] sm:$0xff] }
 0xa25   : > { %v1012_v52 = vpack.c.bf16 %v1011_v47, %v1011_v47  ;;  %971 = vmatpush.bf16.msrb.mxu1 %v962_v50  ;;  %1313 = vmatpush.bf16.msrb.mxu3 %v1697_v49  ;;  %v1696_v50 = vld [vmem:[%s2515_s6 + $0x20] sm:$0xff] }
 0xa27   : > { %1610 = vmatmul.msk.bf16.vlgmr.msra.gmra.mxu2 %vm446_vm1, %v1012_v52 }
 0xa28   : > { %1608 = vmatmul.msk.bf16.vlgmr.msrb.gmra.mxu1 %vm446_vm1, %v955_v53 }
 0xa29   : > { %1085 = vmatpush.bf16.msra.mxu1 %v1076_v51  ;;  %1314 = vmatpush.bf16.msrb.mxu3 %v1696_v50  ;;  %v1812_v51 = vld [vmem:[%s2514_s5 + $0x1] ss:$0 sm:$0xff] }
 0xa2a   : > { %v1854_v2 = vpop.eup %1853 }
 0xa2b   : > { %v1123_v55 = vpop.xlane.xlu0 %1122  ;;  %v1068_v56 = vmul.f32 %v1854_v2, %v1846_v33 }
 0xa2c   : > { %1855 = vrcp.f32 %v1123_v55 }
 0xa2d   : > { %v1069_v57 = vpack.c.bf16 %v1068_v56, %v1068_v56  ;;  %1260 = vmatpush.bf16.msrb.mxu1 %v1695_v28  ;;  %v1813_v56 = vld [vmem:[#allocation8 + $0x7] ss:$0 sm:$0xff] }
 0xa32   : > { %v1856_v58 = vpop.eup %1855 }
 0xa33   : > { %v1125_v59 = vmul.f32 %v1856_v58, %v1848_v36 }
 0xa35   : > { %v1126_v62 = vpack.c.bf16 %v1125_v59, %v1125_v59 }
 0xa38   : > { %1612 = vmatmul.msk.bf16.vlgmr.msra.gmra.mxu1 %vm446_vm1, %v1069_v57 }
 0xa3e   : > { %v1128_v60 = vpop.permute.xlu0 %1127 }
 0xa3f   : > { %v1133_v61 = vsel %vm484_vm2, %v1128_v60, 0 }
 0xa40   : > { %1142 = vmatpush.bf16.msrb.mxu2 %v1133_v61 }
 0xa43   : > { %1614 = vmatmul.msk.bf16.vlgmr.msrb.gmra.mxu2 %vm446_vm1, %v1126_v62 }
 0xaa5   : > { %v973_v63 = vpop.f32.mrf.mxu1 }
 0xaaa   : > { %v1030_v0 = vpop.f32.mrf.mxu2 }
 0xaab   : > { %1149 = vrot.lane.b32.xlu2 %v1030_v0, %s2545_s14  ;;  %s1428_s14 = sshll.u32 %s1424_s23, 4  ;;  %s1429_s14 = int_to_ptr.hbm [resolvable:$true] %s1428_s14 }
 0xaad   : > { %v975_v1 = vpop.f32.mrf.mxu1 }
 0xab2   : > { %v1032_v3 = vpop.f32.mrf.mxu2 }
 0xab5   : > { %v1087_v4 = vpop.f32.mrf.mxu1 }
 0xab6   : > { %1153 = vrot.lane.b32.xlu1 %v1087_v4, %s2546_s15  ;;  %s1414_s15 = scalar_lea.sflag [#allocation4], %s2240_s29 }
 0xabd   : > { %v1089_v5 = vpop.f32.mrf.mxu1 }
 0xac6   : > { %v1144_v6 = vpop.f32.mrf.mxu2 }
 0xac7   : > { %1157 = vrot.lane.b32.xlu2 %v1144_v6, %s2547_s21  ;;  %s1997_s21 = sshra.s32 %s1429_s14, 4  ;;  %s1998_s21 = int_to_ptr.hbm [resolvable:$true] %s1997_s21 }
 0xac8   : > { %s1999_s16 = scalar_lea.hbm %s1998_s21, 8  ;;  %p2004_p12 = scmp.lt.s32.totalorder %s1998_s21, %s2518_s9 }
 0xac9   : > { %p2000_p1 = scmp.ne.s32.totalorder %s1998_s21, %s1999_s16  ;;  %p2005_p8 = scmp.lt.s32.totalorder %s2003_s2, %s1999_s16 }
 0xacb   : > { %p2001_p3 = pnand %p2000_p1, %p2209_p13  ;;  %p2006_p7 = por %p2005_p8, %p2004_p12 }
 0xacd   : > { %p2002_p5 = pneg %p2001_p3 }
 0xace   : > { %v1146_v7 = vpop.f32.mrf.mxu2 }
 0xacf   : > { %p2007_p9 = pnand %p2006_p7, %p2002_p5 }
 0xb05   : > { %v1150_v10 = vpop.permute.xlu2 %1149 }
 0xb06   : > { %v1160_v11 = vsel %vm446_vm1, %v973_v63, %v1150_v10 }
 0xb21   : > { %v1158_v13 = vpop.permute.xlu2 %1157 }
 0xb28   : > { %v1154_v12 = vpop.permute.xlu1 %1153 }
 0xb29   : > { %v1161_v14 = vsel %vm685_vm3, %v1160_v11, %v1154_v12 }
 0xb2a   : > { %v1162_v15 = vsel %vm687_vm4, %v1161_v14, %v1158_v13  ;;  %v1814_v13 = vld [vmem:[#allocation8 + $0xa] ss:$0 sm:$0xff] }
 0xb2b   : > { %v1163_v16 = vpack.c.bf16 %v1162_v15, %v1162_v15 }
 0xb2d   : > { %1627 = vmatmul.msk.bf16.vlgmr.msrb.gmra.mxu0 %vm423_vm0, %v1163_v16  ;;  %v1815_v16 = vld [vmem:[#allocation8 + $0xb] ss:$0 sm:$0xff] }
 0xbaa   : > { %v1195_v18 = vpop.f32.mrf.mxu0 }
 0xbab   : > { %v1196_v19 = vadd.f32 %v1809_v17, %v1195_v18 }
 0xbad   : > { %v1199_v20 = vadd.f32 %v1196_v19, %v2370_v45  ;;  %v1694_v45 = vld [vmem:[%s2513_s4 + $0x10] sm:$0xff] }
 0xbae   : > { %1261 = vmatpush.bf16.msrb.mxu1 %v1694_v45 }
 0xbaf   : > { %v1202_v21 = vsel %vm423_vm0, %v1199_v20, 0.0 }
 0xbb0   : > { %1203 = vadd.xlane.f32.xlu1 %v1202_v21 }
 0xbb2   : > { %v1197_v22 = vpop.f32.mrf.mxu0 }
 0xc23   : > { %v1204_v23 = vpop.xlane.xlu1 %1203 }
 0xc24   : > { %v1205_v24 = vmul.f32 %v1204_v23, %v2332_v48 }
 0xc26   : > { %v1206_v25 = vsub.f32 %v1199_v20, %v1205_v24 }
 0xc28   : > { %v1207_v26 = vmul.f32 %v1206_v25, %v1206_v25 }
 0xc2a   : > { %v1208_v27 = vsel %vm423_vm0, %v1207_v26, 0.0  ;;  %v1700_v26 = vld [vmem:[#allocation7] sm:$0xff] }
 0xc2b   : > { %1209 = vadd.xlane.f32.xlu0 %v1208_v27 }
 0xc9e   : > { %v1210_v30 = vpop.xlane.xlu0 %1209 }
 0xc9f   : > { %v1211_v31 = vmul.f32 %v1210_v30, %v2332_v48 }
 0xca1   : > { %v1212_v33 = vadd.f32 1e-05, %v1211_v31 }
 0xca3   : > { %1857 = vrsqrt.f32 %v1212_v33  ;;  %vm1219_vm14 = vweird.f32 %v1212_v33 }
 0xca9   : > { %v1858_v34 = vpop.eup %1857 }
 0xcaa   : > { %v1214_v35 = vmul.f32 %v1858_v34, %v1212_v33  ;;  %vm1220_vm13 = vweird.f32 %v1858_v34 }
 0xcab   : > { %vm1221_vm15 = vmor %vm1219_vm14, %vm1220_vm13 }
 0xcac   : > { %v1215_v36 = vmul.f32 %v1858_v34, %v1214_v35  ;;  %v1816_v35 = vld [vmem:[#allocation8 + $0xc] ss:$0 sm:$0xff] }
 0xcae   : > { %v1216_v37 = vmul.f32 0.5, %v1215_v36 }
 0xcb0   : > { %v1217_v38 = vsub.f32 1.5, %v1216_v37 }
 0xcb2   : > { %v1218_v39 = vmul.f32 %v1858_v34, %v1217_v38  ;;  %v1817_v38 = vld [vmem:[#allocation8 + $0xd] ss:$0 sm:$0xff] }
 0xcb4   : > { %v1222_v41 = vsel %vm1221_vm15, %v1858_v34, %v1218_v39 }
 0xcb5   : > { %v1223_v43 = vmul.f32 %v1222_v41, %v1206_v25  ;;  %v1701_v25 = vld [vmem:[#allocation7 + $0x8] sm:$0xff]  ;;  %v1818_v41 = vld [vmem:[#allocation8 + $0xe] ss:$0 sm:$0xff] }
 0xcb6   : > { %1405 = vmatpush.bf16.msra.mxu2 %v1701_v25 }
 0xcb7   : > { %v1225_v44 = vmul.f32 %v1810_v40, %v1223_v43 }
 0xcb9   : > { %v1227_v46 = vadd.f32 %v1811_v42, %v1225_v44 }
 0xcba   : > { %1406 = vmatpush.bf16.msra.mxu2 %v1700_v26 }
 0xcbb   : > { %v1228_v47 = vpack.c.bf16 %v1227_v46, %v1227_v46 }
 0xcbd   : > { %1641 = vmatmul.msk.bf16.vlgmr.msrb.gmra.mxu1 %vm423_vm0, %v1228_v47 }
 0xd3a   : > { %v1263_v52 = vpop.f32.mrf.mxu1 }
 0xd3b   : > { %v1264_v53 = vadd.f32 %v1812_v51, %v1263_v52 }
 0xd3d   : > { %v1267_v54 = vmax.f32 %v1264_v53, 0.0 }
 0xd3f   : > { %v1268_v2 = vpack.c.bf16 %v1267_v54, %v1267_v54 }
 0xd41   : > { %1666 = vmatmul.msk.bf16.vlgmr.msrb.gmra.mxu3 %vm833_vm9, %v1268_v2 }
 0xd42   : > { %v1265_v55 = vpop.f32.mrf.mxu1 }
 0xdc4   : > { %v1316_v57 = vpop.f32.mrf.mxu3 }
 0xdc5   : > { %v1317_v58 = vadd.f32 %v1813_v56, %v1316_v57 }
 0xdc7   : > { %v1320_v59 = vadd.f32 %v1317_v58, %v1227_v46 }
 0xdc9   : > { %v1323_v60 = vsel %vm423_vm0, %v1320_v59, 0.0 }
 0xdca   : > { %1324 = vadd.xlane.f32.xlu2 %v1323_v60 }
 0xdcc   : > { %v1318_v61 = vpop.f32.mrf.mxu3 }
 0xe3d   : > { %v1325_v62 = vpop.xlane.xlu2 %1324 }
 0xe3e   : > { %v1326_v63 = vmul.f32 %v1325_v62, %v2332_v48 }
 0xe40   : > { %v1327_v0 = vsub.f32 %v1320_v59, %v1326_v63 }
 0xe42   : > { %v1328_v1 = vmul.f32 %v1327_v0, %v1327_v0 }
 0xe44   : > { %v1329_v3 = vsel %vm423_vm0, %v1328_v1, 0.0 }
 0xe45   : > { %1330 = vadd.xlane.f32.xlu1 %v1329_v3 }
 0xeb8   : > { %v1331_v4 = vpop.xlane.xlu1 %1330 }
 0xeb9   : > { %v1332_v5 = vmul.f32 %v1331_v4, %v2332_v48 }
 0xebb   : > { %v1333_v6 = vadd.f32 1e-05, %v1332_v5 }
 0xebd   : > { %1859 = vrsqrt.f32 %v1333_v6  ;;  %vm1340_vm2 = vweird.f32 %v1333_v6 }
 0xec3   : > { %v1860_v7 = vpop.eup %1859 }
 0xec4   : > { %v1335_v8 = vmul.f32 %v1860_v7, %v1333_v6  ;;  %vm1341_vm1 = vweird.f32 %v1860_v7 }
 0xec5   : > { %vm1342_vm3 = vmor %vm1340_vm2, %vm1341_vm1 }
 0xec6   : > { %v1336_v9 = vmul.f32 %v1860_v7, %v1335_v8 }
 0xec8   : > { %v1337_v10 = vmul.f32 0.5, %v1336_v9 }
 0xeca   : > { %v1338_v11 = vsub.f32 1.5, %v1337_v10 }
 0xecc   : > { %v1339_v12 = vmul.f32 %v1860_v7, %v1338_v11 }
 0xece   : > { %v1343_v14 = vsel %vm1342_vm3, %v1860_v7, %v1339_v12 }
 0xecf   : > { %v1344_v15 = vmul.f32 %v1343_v14, %v1327_v0 }
 0xed1   : > { %v1346_v17 = vmul.f32 %v1814_v13, %v1344_v15 }
 0xed3   : > { %v1348_v18 = vadd.f32 %v1815_v16, %v1346_v17 }
 0xed5   : > { %v1351_v19 = vsel %vm423_vm0, %v1348_v18, 0.0 }
 0xed6   : > { %1352 = vadd.xlane.f32.xlu0 %v1351_v19 }
 0xf49   : > { %v1353_v20 = vpop.xlane.xlu0 %1352 }
 0xf4a   : > { %v1354_v21 = vmul.f32 %v1353_v20, %v2332_v48 }
 0xf4c   : > { %v1355_v22 = vsub.f32 %v1348_v18, %v1354_v21 }
 0xf4e   : > { %v1356_v23 = vmul.f32 %v1355_v22, %v1355_v22 }
 0xf50   : > { %v1357_v24 = vsel %vm423_vm0, %v1356_v23, 0.0 }
 0xf51   : > { %1358 = vadd.xlane.f32.xlu2 %v1357_v24 }
 0xfc4   : > { %v1359_v27 = vpop.xlane.xlu2 %1358 }
 0xfc5   : > { %v1360_v28 = vmul.f32 %v1359_v27, %v2332_v48 }
 0xfc7   : > { %v1361_v45 = vadd.f32 1e-05, %v1360_v28 }
 0xfc9   : > { %1861 = vrsqrt.f32 %v1361_v45  ;;  %vm1368_vm5 = vweird.f32 %v1361_v45 }
 0xfcf   : > { %v1862_v29 = vpop.eup %1861 }
 0xfd0   : > { %v1363_v30 = vmul.f32 %v1862_v29, %v1361_v45  ;;  %vm1369_vm4 = vweird.f32 %v1862_v29 }
 0xfd1   : > { %vm1370_vm6 = vmor %vm1368_vm5, %vm1369_vm4 }
 0xfd2   : > { %v1364_v31 = vmul.f32 %v1862_v29, %v1363_v30 }
 0xfd4   : > { %v1365_v32 = vmul.f32 0.5, %v1364_v31 }
 0xfd6   : > { %v1366_v33 = vsub.f32 1.5, %v1365_v32 }
 0xfd8   : > { %v1367_v34 = vmul.f32 %v1862_v29, %v1366_v33 }
 0xfda   : > { %v1371_v36 = vsel %vm1370_vm6, %v1862_v29, %v1367_v34 }
 0xfdb   : > { %v1372_v37 = vmul.f32 %v1371_v36, %v1355_v22 }
 0xfdd   : > { %v1374_v39 = vmul.f32 %v1816_v35, %v1372_v37 }
 0xfdf   : > { %v1376_v48 = vadd.f32 %v1817_v38, %v1374_v39 }
 0xfe1   : > { %v1377_v40 = vpack.c.bf16 %v1376_v48, %v1376_v48 }
 0xfe3   : > { %1675 = vmatmul.msk.bf16.vlgmr.msra.gmra.mxu2 %vm423_vm0, %v1377_v40 }
0x1066   : > { %v1408_v42 = vpop.f32.mrf.mxu2 }
0x1067   : > { %v1409_v43 = vadd.f32 %v1818_v41, %v1408_v42 }
0x1069   : > { %1412 = vst.msk [vmem:[%s399_s24] sm:$0xff] %vm423_vm0, %v1409_v43 }
0x106a   : > { %2010 = shalt.err (!%p2007_p9)
}
0x106b   : > { %1716 = dma.vmem_to_hbm [thread:$0]  (%p2209_p13), %s1427_s20, 128, %s1429_s14, %s1414_s15  }
0x106e   : > { %v1410_v44 = vpop.f32.mrf.mxu2 }
0x106f PF: > { %s1440_s29 = sand.u32 1, %s2045_s30   ;;  %p2549_p10 = scmp.ge.s32.totalorder %s2057_s12, 2 }
0x1070   : > { %s1441_s19 = scalar_lea.sflag [#allocation4], %s1440_s29 }
0x1071   : > { %p1733_p11 = pnand %p2549_p10, %p2214_p4 }
0x1073   : > { %p1734_p0 = pneg %p1733_p11 }
0x1075   : > { %2040 = dma.done.wait (%p1734_p0), %s1441_s19, 128  }
0x1076   : > { %2042 = vsyncadd (%p1734_p0), %s1441_s19, 4294967168  ;;  %p24_p2 = scmp.ge.s32.totalorder %s2189_s22, 4   ;;  %s2550_s30 = smov %s2049_s10 }
0x1077   : > { %s2551_s10 = smov %s2053_s11  ;;  %s2552_s11 = smov %s2201_s27 }
0x1078   : > { %s2553_s12 = smov %s2189_s22  ;;  %26 = sbr.rel (!%p24_p2) target bundleno = 11 (0xb), region = 119 }
0x107d   :  { %1447 = vsyncpa [#allocation3], 1 }
0x107e   :  { %1449 = vsyncpa [#allocation3 + $0x1], 1 }
0x107f   :  { %1450 = vsyncpa [#allocation6], 1 }
0x1080   :  { %1451 = vsyncpa [#allocation9], 1 }
0x1081   :  { %1452 = vsyncpa [#allocation4], 1 }
0x1082   :  { %1454 = vsyncpa [#allocation4 + $0x1], 1 }

</bundles_post_ra>
